<compile_context>
chip_gen: v7x
topology: tpu7x:2x2x1
jax: 0.10.0
libtpu: 0.0.40
codegen_flags: <defaults>
</compile_context>

<pallas_src>
import functools

import jax
import jax.numpy as jnp
from jax.experimental import pallas as pl
from jax.experimental.pallas import tpu as pltpu


LANES = 128                      # fc1 width == 4*H == padded lane width
WEIGHTS_DTYPE = jnp.float32      # jnp.bfloat16 is the v6e/v7x MXU knob (loosen tol)


def _round8(n):
    return ((n + 7) // 8) * 8


def _slab_layout(num_layers, D, H, n_cat, num_emb):
    """Static row offsets (8-aligned) of every constant block inside the slab."""
    layout = {}
    off = 0

    def add(name, rows):
        nonlocal off
        layout[name] = off
        off += _round8(rows)

    add("w_ih_0", D)
    add("w_hh_0", H)
    add("bias_0", 1)
    for l in range(1, num_layers):
        add(f"w_ih_{l}", H)
        add(f"w_hh_{l}", H)
        add(f"bias_{l}", 1)
    add("w1s", H)
    add("emb_tab", n_cat * num_emb)
    add("b1", 1)
    add("w2", LANES)
    add("b2", 1)
    return layout, off


# ----------------------------------------------------------------------------
# Pallas kernel: wavefront multi-layer LSTM + fused emb/fc1 one-hot GEMM +
# MLP head + log_softmax.  One VMEM weight slab, one VMEM activation slab,
# one SMEM index vector.
# ----------------------------------------------------------------------------
def _make_lstm_head_kernel(layout, num_layers, T, B, D, H, n_cat, num_emb,
                           num_classes):
    EMB_ROWS = _round8(n_cat * num_emb)

    def kernel(x_ref, xs_ref, slab_ref, out_ref):
        def wblk(name, rows):
            off = layout[name]
            return slab_ref[off:off + rows, :]

        def mxu_dot(a, w):
            # Cast the activation operand to the weight dtype (no-op for f32,
            # enables the native bf16 MXU path when WEIGHTS_DTYPE = bf16),
            # accumulate in f32.
            return jnp.dot(a.astype(w.dtype), w,
                           preferred_element_type=jnp.float32)

        # ---- off-critical-path: embedding + fc1-embedding block as ONE GEMM ----
        # emb_tab row (c*num_emb + idx) == emb_w[idx] @ fc1_w[:, H+c*64:H+(c+1)*64].T
        emb_tab = wblk("emb_tab", EMB_ROWS)                      # (32, 128), zero-padded
        row_id = jax.lax.broadcasted_iota(jnp.int32, (B, EMB_ROWS), 0)
        col_id = jax.lax.broadcasted_iota(jnp.int32, (B, EMB_ROWS), 1)
        onehot = jnp.zeros((B, EMB_ROWS), jnp.float32)
        for b in range(B):
            for cat in range(n_cat):
                tgt = cat * num_emb + xs_ref[b * n_cat + cat]    # SMEM scalar
                onehot = onehot + jnp.where(
                    (row_id == b) & (col_id == tgt), 1.0, 0.0)
        emb_fc1 = mxu_dot(onehot, emb_tab)                       # (B, 128)

        # ---- hoisted layer-0 input projection for all T timesteps (time-major) ----
        w_ih0 = wblk("w_ih_0", D)                                # (D, 4H)
        bias0 = wblk("bias_0", 1).astype(jnp.float32)            # (1, 4H)
        xg0 = mxu_dot(x_ref[...], w_ih0) + bias0                 # (T*B, 4H), row = t*B + b

        w_hh = [wblk(f"w_hh_{l}", H) for l in range(num_layers)]
        w_ih = [None] + [wblk(f"w_ih_{l}", H) for l in range(1, num_layers)]
        bias = [None] + [wblk(f"bias_{l}", 1).astype(jnp.float32)
                         for l in range(1, num_layers)]

        def lstm_cell(g_in, h_prev, c_prev, w_hh_l):
            # Single add adjacent to the dot (MRB-foldable on v7x).
            gates = g_in + mxu_dot(h_prev, w_hh_l)               # (B, 4H) f32
            # 2 full-vreg EUP pushes instead of 4 sliced ones.
            sg = jax.nn.sigmoid(gates)
            th = jnp.tanh(gates)
            # PyTorch gate order: i, f, g, o
            i_g = sg[:, 0 * H:1 * H]
            f_g = sg[:, 1 * H:2 * H]
            g_g = th[:, 2 * H:3 * H]
            o_g = sg[:, 3 * H:4 * H]
            c_new = f_g * c_prev + i_g * g_g
            h_new = o_g * jnp.tanh(c_new)
            return h_new, c_new

        h = [jnp.zeros((B, H), jnp.float32) for _ in range(num_layers)]
        c = [jnp.zeros((B, H), jnp.float32) for _ in range(num_layers)]

        # ---- wavefront schedule: step s runs layer l's cell at t = s - l ----
        # Cells of the same step are mutually independent (layer l at t uses
        # h^{l-1}_t produced at step s-1), so the dependent chain is T+L-1 cells.
        for s in range(T + num_layers - 1):
            h_next = list(h)
            c_next = list(c)
            for l in range(num_layers):
                t = s - l
                if 0 <= t < T:
                    if l == 0:
                        g_in = xg0[t * B:(t + 1) * B, :]          # contiguous sublane slice
                    else:
                        g_in = mxu_dot(h[l - 1], w_ih[l]) + bias[l]
                    h_next[l], c_next[l] = lstm_cell(g_in, h[l], c[l], w_hh[l])
            h, c = h_next, c_next

        out_last = h[num_layers - 1]                             # (B, H), t = T-1

        # ---- head: fc1 (hidden block) + fused emb block + ReLU + fc2 + log_softmax ----
        w1s = wblk("w1s", H)                                     # (H, 128)
        b1 = wblk("b1", 1).astype(jnp.float32)                   # (1, 128)
        z1 = jnp.maximum(mxu_dot(out_last, w1s) + emb_fc1 + b1, 0.0)   # (B, 128)

        w2 = wblk("w2", LANES)                                   # (128, 128) zero-padded cols
        b2 = wblk("b2", 1).astype(jnp.float32)                   # (1, 128) zero-padded
        logits = (mxu_dot(z1, w2) + b2)[:, :num_classes]         # (B, C)

        m = jnp.max(logits, axis=1, keepdims=True)
        sh = logits - m
        lse = jnp.log(jnp.sum(jnp.exp(sh), axis=1, keepdims=True))
        out_ref[...] = sh - lse

    return kernel


# ----------------------------------------------------------------------------
# One-time weight pre-packing into a single (R, 128) slab
# (transposes, b_ih+b_hh fold, fc1 split, emb@fc1 fuse, fc2 lane padding)
# ----------------------------------------------------------------------------
def pack_params(params, input_size_cat, out_emb=64, weights_dtype=WEIGHTS_DTYPE):
    H = params["hidden_size"]
    L = params["num_layers"]
    D = params["w_ih_0"].shape[1]
    num_emb = params["emb_w"].shape[0]
    num_classes = params["fc2_b"].shape[0]
    hp = jax.lax.Precision.HIGHEST

    assert 4 * H <= LANES and params["fc1_b"].shape[0] == LANES
    assert num_classes <= LANES

    layout, total_rows = _slab_layout(L, D, H, input_size_cat, num_emb)
    slab = jnp.zeros((total_rows, LANES), jnp.float32)

    def put(slab, name, block):
        block = jnp.asarray(block, jnp.float32)
        r, cc = block.shape
        off = layout[name]
        return slab.at[off:off + r, :cc].set(block)

    slab = put(slab, "w_ih_0", params["w_ih_0"].T)                       # (D, 4H)
    slab = put(slab, "w_hh_0", params["w_hh_0"].T)                       # (H, 4H)
    slab = put(slab, "bias_0", (params["b_ih_0"] + params["b_hh_0"])[None, :])
    for l in range(1, L):
        slab = put(slab, f"w_ih_{l}", params[f"w_ih_{l}"].T)             # (H, 4H)
        slab = put(slab, f"w_hh_{l}", params[f"w_hh_{l}"].T)             # (H, 4H)
        slab = put(slab, f"bias_{l}",
                   (params[f"b_ih_{l}"] + params[f"b_hh_{l}"])[None, :])

    w1 = params["fc1_w"]                                                 # (128, H + n_cat*64)
    slab = put(slab, "w1s", w1[:, :H].T)                                 # (H, 128)

    tabs = []
    for c in range(input_size_cat):
        w1e_c = w1[:, H + c * out_emb:H + (c + 1) * out_emb]             # (128, 64)
        tabs.append(jnp.dot(params["emb_w"], w1e_c.T, precision=hp))     # (num_emb, 128)
    slab = put(slab, "emb_tab", jnp.concatenate(tabs, axis=0))           # (n_cat*num_emb, 128)

    slab = put(slab, "b1", params["fc1_b"][None, :])                     # (1, 128)
    slab = put(slab, "w2", params["fc2_w"].T)                            # (128, C)
    slab = put(slab, "b2", params["fc2_b"][None, :])                     # (1, C)
    return slab.astype(weights_dtype)


# ----------------------------------------------------------------------------
# Jitted wrapper: tiny time-major transpose + cast + single pallas_call
# ----------------------------------------------------------------------------
@functools.partial(jax.jit, static_argnames=("num_layers", "hidden_size",
                                             "num_embedding", "num_classes"))
def rnn_forward(x_cont, x_static, slab, *, num_layers, hidden_size,
                num_embedding, num_classes):
    B, T, D = x_cont.shape
    n_cat = x_static.shape[1]
    H = hidden_size

    layout, total_rows = _slab_layout(num_layers, D, H, n_cat, num_embedding)
    assert slab.shape == (total_rows, LANES)

    # 512 B transpose in the wrapper so layer 0 is time-major (contiguous slices).
    x_tm = jnp.transpose(x_cont, (1, 0, 2)).reshape(T * B, D).astype(jnp.float32)
    xs = x_static.reshape(B * n_cat).astype(jnp.int32)

    kernel = _make_lstm_head_kernel(layout, num_layers, T, B, D, H, n_cat,
                                    num_embedding, num_classes)
    return pl.pallas_call(
        kernel,
        out_shape=jax.ShapeDtypeStruct((B, num_classes), jnp.float32),
        in_specs=[pl.BlockSpec(memory_space=pltpu.MemorySpace.VMEM),   # x (T*B, D)
                  pl.BlockSpec(memory_space=pltpu.MemorySpace.SMEM),   # indices
                  pl.BlockSpec(memory_space=pltpu.MemorySpace.VMEM)],  # weight slab
        out_specs=pl.BlockSpec(memory_space=pltpu.MemorySpace.VMEM),
    )(x_tm, xs, slab)


# ----------------------------------------------------------------------------
# Pure-JAX reference (faithful to the PyTorch forward; for correctness check)
# ----------------------------------------------------------------------------
def rnn_forward_ref(x_cont, x_static, params):
    B, T, _ = x_cont.shape
    H = params["hidden_size"]
    num_layers = params["num_layers"]

    emb = jnp.take(params["emb_w"], x_static, axis=0).reshape(B, -1)

    hs = [jnp.zeros((B, H), jnp.float32) for _ in range(num_layers)]
    cs = [jnp.zeros((B, H), jnp.float32) for _ in range(num_layers)]
    for t in range(T):
        inp = x_cont[:, t, :]
        for l in range(num_layers):
            gates = (inp @ params[f"w_ih_{l}"].T + params[f"b_ih_{l}"]
                     + hs[l] @ params[f"w_hh_{l}"].T + params[f"b_hh_{l}"])
            i_g = jax.nn.sigmoid(gates[:, 0 * H:1 * H])
            f_g = jax.nn.sigmoid(gates[:, 1 * H:2 * H])
            g_g = jnp.tanh(gates[:, 2 * H:3 * H])
            o_g = jax.nn.sigmoid(gates[:, 3 * H:4 * H])
            cs[l] = f_g * cs[l] + i_g * g_g
            hs[l] = o_g * jnp.tanh(cs[l])
            inp = hs[l]

    out = jnp.concatenate([hs[-1], emb], axis=1)
    out = jnp.maximum(out @ params["fc1_w"].T + params["fc1_b"], 0.0)
    out = out @ params["fc2_w"].T + params["fc2_b"]
    return jax.nn.log_softmax(out, axis=1)


# ----------------------------------------------------------------------------
# Deterministic parameter init (shapes follow the PyTorch __init__, model='lstm')
# ----------------------------------------------------------------------------
def init_params(key, input_size_cont, input_size_cat, hidden_size, num_classes,
                num_layers, num_embedding, out_emb=64):
    keys = iter(jax.random.split(key, 8 + 4 * num_layers))

    def u(k, shape, bound):
        return jax.random.uniform(k, shape, jnp.float32, -bound, bound)

    p = {"hidden_size": hidden_size, "num_layers": num_layers}
    kH = 1.0 / jnp.sqrt(hidden_size)
    for l in range(num_layers):
        d_in = input_size_cont if l == 0 else hidden_size
        p[f"w_ih_{l}"] = u(next(keys), (4 * hidden_size, d_in), kH)
        p[f"w_hh_{l}"] = u(next(keys), (4 * hidden_size, hidden_size), kH)
        p[f"b_ih_{l}"] = u(next(keys), (4 * hidden_size,), kH)
        p[f"b_hh_{l}"] = u(next(keys), (4 * hidden_size,), kH)

    p["emb_w"] = jax.random.normal(next(keys), (num_embedding, out_emb), jnp.float32)

    fc1_in = hidden_size + out_emb * input_size_cat
    k1 = 1.0 / jnp.sqrt(fc1_in)
    p["fc1_w"] = u(next(keys), (128, fc1_in), k1)
    p["fc1_b"] = u(next(keys), (128,), k1)
    k2 = 1.0 / jnp.sqrt(128.0)
    p["fc2_w"] = u(next(keys), (num_classes, 128), k2)
    p["fc2_b"] = u(next(keys), (num_classes,), k2)
    return p


if __name__ == "__main__":
    B, T = 2, 8
    input_size_cont = 8     # D_cont
    input_size_cat = 3      # number of categorical features
    hidden_size = 32
    num_classes = 5
    num_layers = 2
    num_embedding = 10

    key = jax.random.PRNGKey(0)
    k_par, k_x, k_s = jax.random.split(key, 3)

    params = init_params(k_par, input_size_cont, input_size_cat, hidden_size,
                         num_classes, num_layers, num_embedding)
    slab = jax.block_until_ready(pack_params(params, input_size_cat))  # one-time pre-pack

    x_cont = jax.random.normal(k_x, (B, T, input_size_cont), jnp.float32)
    x_static = jax.random.randint(k_s, (B, input_size_cat), 0, num_embedding)

    out = rnn_forward(x_cont, x_static, slab,
                      num_layers=num_layers, hidden_size=hidden_size,
                      num_embedding=num_embedding, num_classes=num_classes)
    out = jax.block_until_ready(out)

    ref = rnn_forward_ref(x_cont, x_static, params)
    assert out.shape == (B, num_classes)
    assert bool(jnp.allclose(out, ref, atol=3e-5, rtol=3e-5)), "mismatch vs JAX reference"

    print("KERNEL_OK")
</pallas_src>

<mosaic_0001>
module attributes {stable_mosaic.version = 11 : i64} {
  func.func @kernel(%arg0: memref<16x8xf32, #tpu.memory_space<vmem>>, %arg1: memref<6xi32, #tpu.memory_space<smem>>, %arg2: memref<328x128xf32, #tpu.memory_space<vmem>>, %arg3: memref<2x5xf32, #tpu.memory_space<vmem>>) attributes {dimension_semantics = [], scalar_prefetch = 0 : i64, scratch_operands = 0 : i64, tpu.core_type = #tpu.core_type<tc>} {
    %c152 = arith.constant 152 : index
    %c0 = arith.constant 0 : index
    %0 = vector.load %arg2[%c152, %c0] : memref<328x128xf32, #tpu.memory_space<vmem>>, vector<32x128xf32>
    %1 = tpu.iota {dimensions = array<i32: 0>} : vector<2x32xi32>
    %2 = tpu.iota {dimensions = array<i32: 1>} : vector<2x32xi32>
    %cst = arith.constant 0.000000e+00 : f32
    %3 = vector.broadcast %cst : f32 to vector<2x32xf32>
    %c0_0 = arith.constant 0 : index
    %4 = memref.load %arg1[%c0_0] : memref<6xi32, #tpu.memory_space<smem>>
    %c0_i32 = arith.constant 0 : i32
    %5 = arith.addi %c0_i32, %4 : i32
    %c0_i32_1 = arith.constant 0 : i32
    %6 = vector.broadcast %c0_i32_1 : i32 to vector<2x32xi32>
    %7 = arith.cmpi eq, %1, %6 : vector<2x32xi32>
    %8 = vector.broadcast %5 : i32 to vector<2x32xi32>
    %9 = arith.cmpi eq, %2, %8 : vector<2x32xi32>
    %10 = arith.andi %7, %9 : vector<2x32xi1>
    %cst_2 = arith.constant 1.000000e+00 : f32
    %cst_3 = arith.constant 0.000000e+00 : f32
    %11 = vector.broadcast %cst_2 : f32 to vector<2x32xf32>
    %12 = vector.broadcast %cst_3 : f32 to vector<2x32xf32>
    %13 = arith.select %10, %11, %12 : vector<2x32xi1>, vector<2x32xf32>
    %14 = arith.addf %3, %13 : vector<2x32xf32>
    %c1 = arith.constant 1 : index
    %15 = memref.load %arg1[%c1] : memref<6xi32, #tpu.memory_space<smem>>
    %c10_i32 = arith.constant 10 : i32
    %16 = arith.addi %c10_i32, %15 : i32
    %c0_i32_4 = arith.constant 0 : i32
    %17 = vector.broadcast %c0_i32_4 : i32 to vector<2x32xi32>
    %18 = arith.cmpi eq, %1, %17 : vector<2x32xi32>
    %19 = vector.broadcast %16 : i32 to vector<2x32xi32>
    %20 = arith.cmpi eq, %2, %19 : vector<2x32xi32>
    %21 = arith.andi %18, %20 : vector<2x32xi1>
    %cst_5 = arith.constant 1.000000e+00 : f32
    %cst_6 = arith.constant 0.000000e+00 : f32
    %22 = vector.broadcast %cst_5 : f32 to vector<2x32xf32>
    %23 = vector.broadcast %cst_6 : f32 to vector<2x32xf32>
    %24 = arith.select %21, %22, %23 : vector<2x32xi1>, vector<2x32xf32>
    %25 = arith.addf %14, %24 : vector<2x32xf32>
    %c2 = arith.constant 2 : index
    %26 = memref.load %arg1[%c2] : memref<6xi32, #tpu.memory_space<smem>>
    %c20_i32 = arith.constant 20 : i32
    %27 = arith.addi %c20_i32, %26 : i32
    %c0_i32_7 = arith.constant 0 : i32
    %28 = vector.broadcast %c0_i32_7 : i32 to vector<2x32xi32>
    %29 = arith.cmpi eq, %1, %28 : vector<2x32xi32>
    %30 = vector.broadcast %27 : i32 to vector<2x32xi32>
    %31 = arith.cmpi eq, %2, %30 : vector<2x32xi32>
    %32 = arith.andi %29, %31 : vector<2x32xi1>
    %cst_8 = arith.constant 1.000000e+00 : f32
    %cst_9 = arith.constant 0.000000e+00 : f32
    %33 = vector.broadcast %cst_8 : f32 to vector<2x32xf32>
    %34 = vector.broadcast %cst_9 : f32 to vector<2x32xf32>
    %35 = arith.select %32, %33, %34 : vector<2x32xi1>, vector<2x32xf32>
    %36 = arith.addf %25, %35 : vector<2x32xf32>
    %c3 = arith.constant 3 : index
    %37 = memref.load %arg1[%c3] : memref<6xi32, #tpu.memory_space<smem>>
    %c0_i32_10 = arith.constant 0 : i32
    %38 = arith.addi %c0_i32_10, %37 : i32
    %c1_i32 = arith.constant 1 : i32
    %39 = vector.broadcast %c1_i32 : i32 to vector<2x32xi32>
    %40 = arith.cmpi eq, %1, %39 : vector<2x32xi32>
    %41 = vector.broadcast %38 : i32 to vector<2x32xi32>
    %42 = arith.cmpi eq, %2, %41 : vector<2x32xi32>
    %43 = arith.andi %40, %42 : vector<2x32xi1>
    %cst_11 = arith.constant 1.000000e+00 : f32
    %cst_12 = arith.constant 0.000000e+00 : f32
    %44 = vector.broadcast %cst_11 : f32 to vector<2x32xf32>
    %45 = vector.broadcast %cst_12 : f32 to vector<2x32xf32>
    %46 = arith.select %43, %44, %45 : vector<2x32xi1>, vector<2x32xf32>
    %47 = arith.addf %36, %46 : vector<2x32xf32>
    %c4 = arith.constant 4 : index
    %48 = memref.load %arg1[%c4] : memref<6xi32, #tpu.memory_space<smem>>
    %c10_i32_13 = arith.constant 10 : i32
    %49 = arith.addi %c10_i32_13, %48 : i32
    %c1_i32_14 = arith.constant 1 : i32
    %50 = vector.broadcast %c1_i32_14 : i32 to vector<2x32xi32>
    %51 = arith.cmpi eq, %1, %50 : vector<2x32xi32>
    %52 = vector.broadcast %49 : i32 to vector<2x32xi32>
    %53 = arith.cmpi eq, %2, %52 : vector<2x32xi32>
    %54 = arith.andi %51, %53 : vector<2x32xi1>
    %cst_15 = arith.constant 1.000000e+00 : f32
    %cst_16 = arith.constant 0.000000e+00 : f32
    %55 = vector.broadcast %cst_15 : f32 to vector<2x32xf32>
    %56 = vector.broadcast %cst_16 : f32 to vector<2x32xf32>
    %57 = arith.select %54, %55, %56 : vector<2x32xi1>, vector<2x32xf32>
    %58 = arith.addf %47, %57 : vector<2x32xf32>
    %c5 = arith.constant 5 : index
    %59 = memref.load %arg1[%c5] : memref<6xi32, #tpu.memory_space<smem>>
    %c20_i32_17 = arith.constant 20 : i32
    %60 = arith.addi %c20_i32_17, %59 : i32
    %c1_i32_18 = arith.constant 1 : i32
    %61 = vector.broadcast %c1_i32_18 : i32 to vector<2x32xi32>
    %62 = arith.cmpi eq, %1, %61 : vector<2x32xi32>
    %63 = vector.broadcast %60 : i32 to vector<2x32xi32>
    %64 = arith.cmpi eq, %2, %63 : vector<2x32xi32>
    %65 = arith.andi %62, %64 : vector<2x32xi1>
    %cst_19 = arith.constant 1.000000e+00 : f32
    %cst_20 = arith.constant 0.000000e+00 : f32
    %66 = vector.broadcast %cst_19 : f32 to vector<2x32xf32>
    %67 = vector.broadcast %cst_20 : f32 to vector<2x32xf32>
    %68 = arith.select %65, %66, %67 : vector<2x32xi1>, vector<2x32xf32>
    %69 = arith.addf %58, %68 : vector<2x32xf32>
    %cst_21 = arith.constant dense<0.000000e+00> : vector<2x128xf32>
    %70 = tpu.matmul %69, %0, %cst_21 {dimension_numbers = #tpu.dot_dimension_numbers<[1], [0], [0], [1], [0, 0, 1, 1], [], []>} : vector<2x32xf32>, vector<32x128xf32>, vector<2x128xf32> -> vector<2x128xf32>
    %c0_22 = arith.constant 0 : index
    %c0_23 = arith.constant 0 : index
    %71 = vector.load %arg2[%c0_22, %c0_23] : memref<328x128xf32, #tpu.memory_space<vmem>>, vector<8x128xf32>
    %c40 = arith.constant 40 : index
    %c0_24 = arith.constant 0 : index
    %72 = vector.load %arg2[%c40, %c0_24] : memref<328x128xf32, #tpu.memory_space<vmem>>, vector<1x128xf32>
    %c0_25 = arith.constant 0 : index
    %c0_26 = arith.constant 0 : index
    %73 = vector.load %arg0[%c0_25, %c0_26] : memref<16x8xf32, #tpu.memory_space<vmem>>, vector<16x8xf32>
    %cst_27 = arith.constant dense<0.000000e+00> : vector<16x128xf32>
    %74 = tpu.matmul %73, %71, %cst_27 {dimension_numbers = #tpu.dot_dimension_numbers<[1], [0], [0], [1], [0, 0, 1, 1], [], []>} : vector<16x8xf32>, vector<8x128xf32>, vector<16x128xf32> -> vector<16x128xf32>
    %75 = vector.broadcast %72 : vector<1x128xf32> to vector<16x128xf32>
    %76 = arith.addf %74, %75 : vector<16x128xf32>
    %c8 = arith.constant 8 : index
    %c0_28 = arith.constant 0 : index
    %77 = vector.load %arg2[%c8, %c0_28] : memref<328x128xf32, #tpu.memory_space<vmem>>, vector<32x128xf32>
    %c80 = arith.constant 80 : index
    %c0_29 = arith.constant 0 : index
    %78 = vector.load %arg2[%c80, %c0_29] : memref<328x128xf32, #tpu.memory_space<vmem>>, vector<32x128xf32>
    %c48 = arith.constant 48 : index
    %c0_30 = arith.constant 0 : index
    %79 = vector.load %arg2[%c48, %c0_30] : memref<328x128xf32, #tpu.memory_space<vmem>>, vector<32x128xf32>
    %c112 = arith.constant 112 : index
    %c0_31 = arith.constant 0 : index
    %80 = vector.load %arg2[%c112, %c0_31] : memref<328x128xf32, #tpu.memory_space<vmem>>, vector<1x128xf32>
    %cst_32 = arith.constant 0.000000e+00 : f32
    %81 = vector.broadcast %cst_32 : f32 to vector<2x32xf32>
    %cst_33 = arith.constant 0.000000e+00 : f32
    %82 = vector.broadcast %cst_33 : f32 to vector<2x32xf32>
    %cst_34 = arith.constant 0.000000e+00 : f32
    %83 = vector.broadcast %cst_34 : f32 to vector<2x32xf32>
    %cst_35 = arith.constant 0.000000e+00 : f32
    %84 = vector.broadcast %cst_35 : f32 to vector<2x32xf32>
    %85 = vector.extract_strided_slice %76 {offsets = [0, 0], sizes = [2, 128], strides = [1, 1]} : vector<16x128xf32> to vector<2x128xf32>
    %cst_36 = arith.constant dense<0.000000e+00> : vector<2x128xf32>
    %86 = tpu.matmul %81, %77, %cst_36 {dimension_numbers = #tpu.dot_dimension_numbers<[1], [0], [0], [1], [0, 0, 1, 1], [], []>} : vector<2x32xf32>, vector<32x128xf32>, vector<2x128xf32> -> vector<2x128xf32>
    %87 = arith.addf %85, %86 : vector<2x128xf32>
    %88 = arith.negf %87 : vector<2x128xf32>
    %89 = math.exp %88 : vector<2x128xf32>
    %cst_37 = arith.constant 1.000000e+00 : f32
    %90 = vector.broadcast %cst_37 : f32 to vector<2x128xf32>
    %91 = arith.addf %90, %89 : vector<2x128xf32>
    %92 = arith.divf %90, %91 : vector<2x128xf32>
    %93 = math.tanh %87 : vector<2x128xf32>
    %94 = vector.extract_strided_slice %92 {offsets = [0, 0], sizes = [2, 32], strides = [1, 1]} : vector<2x128xf32> to vector<2x32xf32>
    %95 = vector.extract_strided_slice %92 {offsets = [0, 32], sizes = [2, 32], strides = [1, 1]} : vector<2x128xf32> to vector<2x32xf32>
    %96 = vector.extract_strided_slice %93 {offsets = [0, 64], sizes = [2, 32], strides = [1, 1]} : vector<2x128xf32> to vector<2x32xf32>
    %97 = vector.extract_strided_slice %92 {offsets = [0, 96], sizes = [2, 32], strides = [1, 1]} : vector<2x128xf32> to vector<2x32xf32>
    %98 = arith.mulf %95, %83 : vector<2x32xf32>
    %99 = arith.mulf %94, %96 : vector<2x32xf32>
    %100 = arith.addf %98, %99 : vector<2x32xf32>
    %101 = math.tanh %100 : vector<2x32xf32>
    %102 = arith.mulf %97, %101 : vector<2x32xf32>
    %103 = vector.extract_strided_slice %76 {offsets = [2, 0], sizes = [2, 128], strides = [1, 1]} : vector<16x128xf32> to vector<2x128xf32>
    %cst_38 = arith.constant dense<0.000000e+00> : vector<2x128xf32>
    %104 = tpu.matmul %102, %77, %cst_38 {dimension_numbers = #tpu.dot_dimension_numbers<[1], [0], [0], [1], [0, 0, 1, 1], [], []>} : vector<2x32xf32>, vector<32x128xf32>, vector<2x128xf32> -> vector<2x128xf32>
    %105 = arith.addf %103, %104 : vector<2x128xf32>
    %106 = arith.negf %105 : vector<2x128xf32>
    %107 = math.exp %106 : vector<2x128xf32>
    %cst_39 = arith.constant 1.000000e+00 : f32
    %108 = vector.broadcast %cst_39 : f32 to vector<2x128xf32>
    %109 = arith.addf %108, %107 : vector<2x128xf32>
    %110 = arith.divf %108, %109 : vector<2x128xf32>
    %111 = math.tanh %105 : vector<2x128xf32>
    %112 = vector.extract_strided_slice %110 {offsets = [0, 0], sizes = [2, 32], strides = [1, 1]} : vector<2x128xf32> to vector<2x32xf32>
    %113 = vector.extract_strided_slice %110 {offsets = [0, 32], sizes = [2, 32], strides = [1, 1]} : vector<2x128xf32> to vector<2x32xf32>
    %114 = vector.extract_strided_slice %111 {offsets = [0, 64], sizes = [2, 32], strides = [1, 1]} : vector<2x128xf32> to vector<2x32xf32>
    %115 = vector.extract_strided_slice %110 {offsets = [0, 96], sizes = [2, 32], strides = [1, 1]} : vector<2x128xf32> to vector<2x32xf32>
    %116 = arith.mulf %113, %100 : vector<2x32xf32>
    %117 = arith.mulf %112, %114 : vector<2x32xf32>
    %118 = arith.addf %116, %117 : vector<2x32xf32>
    %119 = math.tanh %118 : vector<2x32xf32>
    %120 = arith.mulf %115, %119 : vector<2x32xf32>
    %cst_40 = arith.constant dense<0.000000e+00> : vector<2x128xf32>
    %121 = tpu.matmul %102, %79, %cst_40 {dimension_numbers = #tpu.dot_dimension_numbers<[1], [0], [0], [1], [0, 0, 1, 1], [], []>} : vector<2x32xf32>, vector<32x128xf32>, vector<2x128xf32> -> vector<2x128xf32>
    %122 = vector.broadcast %80 : vector<1x128xf32> to vector<2x128xf32>
    %123 = arith.addf %121, %122 : vector<2x128xf32>
    %cst_41 = arith.constant dense<0.000000e+00> : vector<2x128xf32>
    %124 = tpu.matmul %82, %78, %cst_41 {dimension_numbers = #tpu.dot_dimension_numbers<[1], [0], [0], [1], [0, 0, 1, 1], [], []>} : vector<2x32xf32>, vector<32x128xf32>, vector<2x128xf32> -> vector<2x128xf32>
    %125 = arith.addf %123, %124 : vector<2x128xf32>
    %126 = arith.negf %125 : vector<2x128xf32>
    %127 = math.exp %126 : vector<2x128xf32>
    %cst_42 = arith.constant 1.000000e+00 : f32
    %128 = vector.broadcast %cst_42 : f32 to vector<2x128xf32>
    %129 = arith.addf %128, %127 : vector<2x128xf32>
    %130 = arith.divf %128, %129 : vector<2x128xf32>
    %131 = math.tanh %125 : vector<2x128xf32>
    %132 = vector.extract_strided_slice %130 {offsets = [0, 0], sizes = [2, 32], strides = [1, 1]} : vector<2x128xf32> to vector<2x32xf32>
    %133 = vector.extract_strided_slice %130 {offsets = [0, 32], sizes = [2, 32], strides = [1, 1]} : vector<2x128xf32> to vector<2x32xf32>
    %134 = vector.extract_strided_slice %131 {offsets = [0, 64], sizes = [2, 32], strides = [1, 1]} : vector<2x128xf32> to vector<2x32xf32>
    %135 = vector.extract_strided_slice %130 {offsets = [0, 96], sizes = [2, 32], strides = [1, 1]} : vector<2x128xf32> to vector<2x32xf32>
    %136 = arith.mulf %133, %84 : vector<2x32xf32>
    %137 = arith.mulf %132, %134 : vector<2x32xf32>
    %138 = arith.addf %136, %137 : vector<2x32xf32>
    %139 = math.tanh %138 : vector<2x32xf32>
    %140 = arith.mulf %135, %139 : vector<2x32xf32>
    %141 = vector.extract_strided_slice %76 {offsets = [4, 0], sizes = [2, 128], strides = [1, 1]} : vector<16x128xf32> to vector<2x128xf32>
    %cst_43 = arith.constant dense<0.000000e+00> : vector<2x128xf32>
    %142 = tpu.matmul %120, %77, %cst_43 {dimension_numbers = #tpu.dot_dimension_numbers<[1], [0], [0], [1], [0, 0, 1, 1], [], []>} : vector<2x32xf32>, vector<32x128xf32>, vector<2x128xf32> -> vector<2x128xf32>
    %143 = arith.addf %141, %142 : vector<2x128xf32>
    %144 = arith.negf %143 : vector<2x128xf32>
    %145 = math.exp %144 : vector<2x128xf32>
    %cst_44 = arith.constant 1.000000e+00 : f32
    %146 = vector.broadcast %cst_44 : f32 to vector<2x128xf32>
    %147 = arith.addf %146, %145 : vector<2x128xf32>
    %148 = arith.divf %146, %147 : vector<2x128xf32>
    %149 = math.tanh %143 : vector<2x128xf32>
    %150 = vector.extract_strided_slice %148 {offsets = [0, 0], sizes = [2, 32], strides = [1, 1]} : vector<2x128xf32> to vector<2x32xf32>
    %151 = vector.extract_strided_slice %148 {offsets = [0, 32], sizes = [2, 32], strides = [1, 1]} : vector<2x128xf32> to vector<2x32xf32>
    %152 = vector.extract_strided_slice %149 {offsets = [0, 64], sizes = [2, 32], strides = [1, 1]} : vector<2x128xf32> to vector<2x32xf32>
    %153 = vector.extract_strided_slice %148 {offsets = [0, 96], sizes = [2, 32], strides = [1, 1]} : vector<2x128xf32> to vector<2x32xf32>
    %154 = arith.mulf %151, %118 : vector<2x32xf32>
    %155 = arith.mulf %150, %152 : vector<2x32xf32>
    %156 = arith.addf %154, %155 : vector<2x32xf32>
    %157 = math.tanh %156 : vector<2x32xf32>
    %158 = arith.mulf %153, %157 : vector<2x32xf32>
    %cst_45 = arith.constant dense<0.000000e+00> : vector<2x128xf32>
    %159 = tpu.matmul %120, %79, %cst_45 {dimension_numbers = #tpu.dot_dimension_numbers<[1], [0], [0], [1], [0, 0, 1, 1], [], []>} : vector<2x32xf32>, vector<32x128xf32>, vector<2x128xf32> -> vector<2x128xf32>
    %160 = vector.broadcast %80 : vector<1x128xf32> to vector<2x128xf32>
    %161 = arith.addf %159, %160 : vector<2x128xf32>
    %cst_46 = arith.constant dense<0.000000e+00> : vector<2x128xf32>
    %162 = tpu.matmul %140, %78, %cst_46 {dimension_numbers = #tpu.dot_dimension_numbers<[1], [0], [0], [1], [0, 0, 1, 1], [], []>} : vector<2x32xf32>, vector<32x128xf32>, vector<2x128xf32> -> vector<2x128xf32>
    %163 = arith.addf %161, %162 : vector<2x128xf32>
    %164 = arith.negf %163 : vector<2x128xf32>
    %165 = math.exp %164 : vector<2x128xf32>
    %cst_47 = arith.constant 1.000000e+00 : f32
    %166 = vector.broadcast %cst_47 : f32 to vector<2x128xf32>
    %167 = arith.addf %166, %165 : vector<2x128xf32>
    %168 = arith.divf %166, %167 : vector<2x128xf32>
    %169 = math.tanh %163 : vector<2x128xf32>
    %170 = vector.extract_strided_slice %168 {offsets = [0, 0], sizes = [2, 32], strides = [1, 1]} : vector<2x128xf32> to vector<2x32xf32>
    %171 = vector.extract_strided_slice %168 {offsets = [0, 32], sizes = [2, 32], strides = [1, 1]} : vector<2x128xf32> to vector<2x32xf32>
    %172 = vector.extract_strided_slice %169 {offsets = [0, 64], sizes = [2, 32], strides = [1, 1]} : vector<2x128xf32> to vector<2x32xf32>
    %173 = vector.extract_strided_slice %168 {offsets = [0, 96], sizes = [2, 32], strides = [1, 1]} : vector<2x128xf32> to vector<2x32xf32>
    %174 = arith.mulf %171, %138 : vector<2x32xf32>
    %175 = arith.mulf %170, %172 : vector<2x32xf32>
    %176 = arith.addf %174, %175 : vector<2x32xf32>
    %177 = math.tanh %176 : vector<2x32xf32>
    %178 = arith.mulf %173, %177 : vector<2x32xf32>
    %179 = vector.extract_strided_slice %76 {offsets = [6, 0], sizes = [2, 128], strides = [1, 1]} : vector<16x128xf32> to vector<2x128xf32>
    %cst_48 = arith.constant dense<0.000000e+00> : vector<2x128xf32>
    %180 = tpu.matmul %158, %77, %cst_48 {dimension_numbers = #tpu.dot_dimension_numbers<[1], [0], [0], [1], [0, 0, 1, 1], [], []>} : vector<2x32xf32>, vector<32x128xf32>, vector<2x128xf32> -> vector<2x128xf32>
    %181 = arith.addf %179, %180 : vector<2x128xf32>
    %182 = arith.negf %181 : vector<2x128xf32>
    %183 = math.exp %182 : vector<2x128xf32>
    %cst_49 = arith.constant 1.000000e+00 : f32
    %184 = vector.broadcast %cst_49 : f32 to vector<2x128xf32>
    %185 = arith.addf %184, %183 : vector<2x128xf32>
    %186 = arith.divf %184, %185 : vector<2x128xf32>
    %187 = math.tanh %181 : vector<2x128xf32>
    %188 = vector.extract_strided_slice %186 {offsets = [0, 0], sizes = [2, 32], strides = [1, 1]} : vector<2x128xf32> to vector<2x32xf32>
    %189 = vector.extract_strided_slice %186 {offsets = [0, 32], sizes = [2, 32], strides = [1, 1]} : vector<2x128xf32> to vector<2x32xf32>
    %190 = vector.extract_strided_slice %187 {offsets = [0, 64], sizes = [2, 32], strides = [1, 1]} : vector<2x128xf32> to vector<2x32xf32>
    %191 = vector.extract_strided_slice %186 {offsets = [0, 96], sizes = [2, 32], strides = [1, 1]} : vector<2x128xf32> to vector<2x32xf32>
    %192 = arith.mulf %189, %156 : vector<2x32xf32>
    %193 = arith.mulf %188, %190 : vector<2x32xf32>
    %194 = arith.addf %192, %193 : vector<2x32xf32>
    %195 = math.tanh %194 : vector<2x32xf32>
    %196 = arith.mulf %191, %195 : vector<2x32xf32>
    %cst_50 = arith.constant dense<0.000000e+00> : vector<2x128xf32>
    %197 = tpu.matmul %158, %79, %cst_50 {dimension_numbers = #tpu.dot_dimension_numbers<[1], [0], [0], [1], [0, 0, 1, 1], [], []>} : vector<2x32xf32>, vector<32x128xf32>, vector<2x128xf32> -> vector<2x128xf32>
    %198 = vector.broadcast %80 : vector<1x128xf32> to vector<2x128xf32>
    %199 = arith.addf %197, %198 : vector<2x128xf32>
    %cst_51 = arith.constant dense<0.000000e+00> : vector<2x128xf32>
    %200 = tpu.matmul %178, %78, %cst_51 {dimension_numbers = #tpu.dot_dimension_numbers<[1], [0], [0], [1], [0, 0, 1, 1], [], []>} : vector<2x32xf32>, vector<32x128xf32>, vector<2x128xf32> -> vector<2x128xf32>
    %201 = arith.addf %199, %200 : vector<2x128xf32>
    %202 = arith.negf %201 : vector<2x128xf32>
    %203 = math.exp %202 : vector<2x128xf32>
    %cst_52 = arith.constant 1.000000e+00 : f32
    %204 = vector.broadcast %cst_52 : f32 to vector<2x128xf32>
    %205 = arith.addf %204, %203 : vector<2x128xf32>
    %206 = arith.divf %204, %205 : vector<2x128xf32>
    %207 = math.tanh %201 : vector<2x128xf32>
    %208 = vector.extract_strided_slice %206 {offsets = [0, 0], sizes = [2, 32], strides = [1, 1]} : vector<2x128xf32> to vector<2x32xf32>
    %209 = vector.extract_strided_slice %206 {offsets = [0, 32], sizes = [2, 32], strides = [1, 1]} : vector<2x128xf32> to vector<2x32xf32>
    %210 = vector.extract_strided_slice %207 {offsets = [0, 64], sizes = [2, 32], strides = [1, 1]} : vector<2x128xf32> to vector<2x32xf32>
    %211 = vector.extract_strided_slice %206 {offsets = [0, 96], sizes = [2, 32], strides = [1, 1]} : vector<2x128xf32> to vector<2x32xf32>
    %212 = arith.mulf %209, %176 : vector<2x32xf32>
    %213 = arith.mulf %208, %210 : vector<2x32xf32>
    %214 = arith.addf %212, %213 : vector<2x32xf32>
    %215 = math.tanh %214 : vector<2x32xf32>
    %216 = arith.mulf %211, %215 : vector<2x32xf32>
    %217 = vector.extract_strided_slice %76 {offsets = [8, 0], sizes = [2, 128], strides = [1, 1]} : vector<16x128xf32> to vector<2x128xf32>
    %cst_53 = arith.constant dense<0.000000e+00> : vector<2x128xf32>
    %218 = tpu.matmul %196, %77, %cst_53 {dimension_numbers = #tpu.dot_dimension_numbers<[1], [0], [0], [1], [0, 0, 1, 1], [], []>} : vector<2x32xf32>, vector<32x128xf32>, vector<2x128xf32> -> vector<2x128xf32>
    %219 = arith.addf %217, %218 : vector<2x128xf32>
    %220 = arith.negf %219 : vector<2x128xf32>
    %221 = math.exp %220 : vector<2x128xf32>
    %cst_54 = arith.constant 1.000000e+00 : f32
    %222 = vector.broadcast %cst_54 : f32 to vector<2x128xf32>
    %223 = arith.addf %222, %221 : vector<2x128xf32>
    %224 = arith.divf %222, %223 : vector<2x128xf32>
    %225 = math.tanh %219 : vector<2x128xf32>
    %226 = vector.extract_strided_slice %224 {offsets = [0, 0], sizes = [2, 32], strides = [1, 1]} : vector<2x128xf32> to vector<2x32xf32>
    %227 = vector.extract_strided_slice %224 {offsets = [0, 32], sizes = [2, 32], strides = [1, 1]} : vector<2x128xf32> to vector<2x32xf32>
    %228 = vector.extract_strided_slice %225 {offsets = [0, 64], sizes = [2, 32], strides = [1, 1]} : vector<2x128xf32> to vector<2x32xf32>
    %229 = vector.extract_strided_slice %224 {offsets = [0, 96], sizes = [2, 32], strides = [1, 1]} : vector<2x128xf32> to vector<2x32xf32>
    %230 = arith.mulf %227, %194 : vector<2x32xf32>
    %231 = arith.mulf %226, %228 : vector<2x32xf32>
    %232 = arith.addf %230, %231 : vector<2x32xf32>
    %233 = math.tanh %232 : vector<2x32xf32>
    %234 = arith.mulf %229, %233 : vector<2x32xf32>
    %cst_55 = arith.constant dense<0.000000e+00> : vector<2x128xf32>
    %235 = tpu.matmul %196, %79, %cst_55 {dimension_numbers = #tpu.dot_dimension_numbers<[1], [0], [0], [1], [0, 0, 1, 1], [], []>} : vector<2x32xf32>, vector<32x128xf32>, vector<2x128xf32> -> vector<2x128xf32>
    %236 = vector.broadcast %80 : vector<1x128xf32> to vector<2x128xf32>
    %237 = arith.addf %235, %236 : vector<2x128xf32>
    %cst_56 = arith.constant dense<0.000000e+00> : vector<2x128xf32>
    %238 = tpu.matmul %216, %78, %cst_56 {dimension_numbers = #tpu.dot_dimension_numbers<[1], [0], [0], [1], [0, 0, 1, 1], [], []>} : vector<2x32xf32>, vector<32x128xf32>, vector<2x128xf32> -> vector<2x128xf32>
    %239 = arith.addf %237, %238 : vector<2x128xf32>
    %240 = arith.negf %239 : vector<2x128xf32>
    %241 = math.exp %240 : vector<2x128xf32>
    %cst_57 = arith.constant 1.000000e+00 : f32
    %242 = vector.broadcast %cst_57 : f32 to vector<2x128xf32>
    %243 = arith.addf %242, %241 : vector<2x128xf32>
    %244 = arith.divf %242, %243 : vector<2x128xf32>
    %245 = math.tanh %239 : vector<2x128xf32>
    %246 = vector.extract_strided_slice %244 {offsets = [0, 0], sizes = [2, 32], strides = [1, 1]} : vector<2x128xf32> to vector<2x32xf32>
    %247 = vector.extract_strided_slice %244 {offsets = [0, 32], sizes = [2, 32], strides = [1, 1]} : vector<2x128xf32> to vector<2x32xf32>
    %248 = vector.extract_strided_slice %245 {offsets = [0, 64], sizes = [2, 32], strides = [1, 1]} : vector<2x128xf32> to vector<2x32xf32>
    %249 = vector.extract_strided_slice %244 {offsets = [0, 96], sizes = [2, 32], strides = [1, 1]} : vector<2x128xf32> to vector<2x32xf32>
    %250 = arith.mulf %247, %214 : vector<2x32xf32>
    %251 = arith.mulf %246, %248 : vector<2x32xf32>
    %252 = arith.addf %250, %251 : vector<2x32xf32>
    %253 = math.tanh %252 : vector<2x32xf32>
    %254 = arith.mulf %249, %253 : vector<2x32xf32>
    %255 = vector.extract_strided_slice %76 {offsets = [10, 0], sizes = [2, 128], strides = [1, 1]} : vector<16x128xf32> to vector<2x128xf32>
    %cst_58 = arith.constant dense<0.000000e+00> : vector<2x128xf32>
    %256 = tpu.matmul %234, %77, %cst_58 {dimension_numbers = #tpu.dot_dimension_numbers<[1], [0], [0], [1], [0, 0, 1, 1], [], []>} : vector<2x32xf32>, vector<32x128xf32>, vector<2x128xf32> -> vector<2x128xf32>
    %257 = arith.addf %255, %256 : vector<2x128xf32>
    %258 = arith.negf %257 : vector<2x128xf32>
    %259 = math.exp %258 : vector<2x128xf32>
    %cst_59 = arith.constant 1.000000e+00 : f32
    %260 = vector.broadcast %cst_59 : f32 to vector<2x128xf32>
    %261 = arith.addf %260, %259 : vector<2x128xf32>
    %262 = arith.divf %260, %261 : vector<2x128xf32>
    %263 = math.tanh %257 : vector<2x128xf32>
    %264 = vector.extract_strided_slice %262 {offsets = [0, 0], sizes = [2, 32], strides = [1, 1]} : vector<2x128xf32> to vector<2x32xf32>
    %265 = vector.extract_strided_slice %262 {offsets = [0, 32], sizes = [2, 32], strides = [1, 1]} : vector<2x128xf32> to vector<2x32xf32>
    %266 = vector.extract_strided_slice %263 {offsets = [0, 64], sizes = [2, 32], strides = [1, 1]} : vector<2x128xf32> to vector<2x32xf32>
    %267 = vector.extract_strided_slice %262 {offsets = [0, 96], sizes = [2, 32], strides = [1, 1]} : vector<2x128xf32> to vector<2x32xf32>
    %268 = arith.mulf %265, %232 : vector<2x32xf32>
    %269 = arith.mulf %264, %266 : vector<2x32xf32>
    %270 = arith.addf %268, %269 : vector<2x32xf32>
    %271 = math.tanh %270 : vector<2x32xf32>
    %272 = arith.mulf %267, %271 : vector<2x32xf32>
    %cst_60 = arith.constant dense<0.000000e+00> : vector<2x128xf32>
    %273 = tpu.matmul %234, %79, %cst_60 {dimension_numbers = #tpu.dot_dimension_numbers<[1], [0], [0], [1], [0, 0, 1, 1], [], []>} : vector<2x32xf32>, vector<32x128xf32>, vector<2x128xf32> -> vector<2x128xf32>
    %274 = vector.broadcast %80 : vector<1x128xf32> to vector<2x128xf32>
    %275 = arith.addf %273, %274 : vector<2x128xf32>
    %cst_61 = arith.constant dense<0.000000e+00> : vector<2x128xf32>
    %276 = tpu.matmul %254, %78, %cst_61 {dimension_numbers = #tpu.dot_dimension_numbers<[1], [0], [0], [1], [0, 0, 1, 1], [], []>} : vector<2x32xf32>, vector<32x128xf32>, vector<2x128xf32> -> vector<2x128xf32>
    %277 = arith.addf %275, %276 : vector<2x128xf32>
    %278 = arith.negf %277 : vector<2x128xf32>
    %279 = math.exp %278 : vector<2x128xf32>
    %cst_62 = arith.constant 1.000000e+00 : f32
    %280 = vector.broadcast %cst_62 : f32 to vector<2x128xf32>
    %281 = arith.addf %280, %279 : vector<2x128xf32>
    %282 = arith.divf %280, %281 : vector<2x128xf32>
    %283 = math.tanh %277 : vector<2x128xf32>
    %284 = vector.extract_strided_slice %282 {offsets = [0, 0], sizes = [2, 32], strides = [1, 1]} : vector<2x128xf32> to vector<2x32xf32>
    %285 = vector.extract_strided_slice %282 {offsets = [0, 32], sizes = [2, 32], strides = [1, 1]} : vector<2x128xf32> to vector<2x32xf32>
    %286 = vector.extract_strided_slice %283 {offsets = [0, 64], sizes = [2, 32], strides = [1, 1]} : vector<2x128xf32> to vector<2x32xf32>
    %287 = vector.extract_strided_slice %282 {offsets = [0, 96], sizes = [2, 32], strides = [1, 1]} : vector<2x128xf32> to vector<2x32xf32>
    %288 = arith.mulf %285, %252 : vector<2x32xf32>
    %289 = arith.mulf %284, %286 : vector<2x32xf32>
    %290 = arith.addf %288, %289 : vector<2x32xf32>
    %291 = math.tanh %290 : vector<2x32xf32>
    %292 = arith.mulf %287, %291 : vector<2x32xf32>
    %293 = vector.extract_strided_slice %76 {offsets = [12, 0], sizes = [2, 128], strides = [1, 1]} : vector<16x128xf32> to vector<2x128xf32>
    %cst_63 = arith.constant dense<0.000000e+00> : vector<2x128xf32>
    %294 = tpu.matmul %272, %77, %cst_63 {dimension_numbers = #tpu.dot_dimension_numbers<[1], [0], [0], [1], [0, 0, 1, 1], [], []>} : vector<2x32xf32>, vector<32x128xf32>, vector<2x128xf32> -> vector<2x128xf32>
    %295 = arith.addf %293, %294 : vector<2x128xf32>
    %296 = arith.negf %295 : vector<2x128xf32>
    %297 = math.exp %296 : vector<2x128xf32>
    %cst_64 = arith.constant 1.000000e+00 : f32
    %298 = vector.broadcast %cst_64 : f32 to vector<2x128xf32>
    %299 = arith.addf %298, %297 : vector<2x128xf32>
    %300 = arith.divf %298, %299 : vector<2x128xf32>
    %301 = math.tanh %295 : vector<2x128xf32>
    %302 = vector.extract_strided_slice %300 {offsets = [0, 0], sizes = [2, 32], strides = [1, 1]} : vector<2x128xf32> to vector<2x32xf32>
    %303 = vector.extract_strided_slice %300 {offsets = [0, 32], sizes = [2, 32], strides = [1, 1]} : vector<2x128xf32> to vector<2x32xf32>
    %304 = vector.extract_strided_slice %301 {offsets = [0, 64], sizes = [2, 32], strides = [1, 1]} : vector<2x128xf32> to vector<2x32xf32>
    %305 = vector.extract_strided_slice %300 {offsets = [0, 96], sizes = [2, 32], strides = [1, 1]} : vector<2x128xf32> to vector<2x32xf32>
    %306 = arith.mulf %303, %270 : vector<2x32xf32>
    %307 = arith.mulf %302, %304 : vector<2x32xf32>
    %308 = arith.addf %306, %307 : vector<2x32xf32>
    %309 = math.tanh %308 : vector<2x32xf32>
    %310 = arith.mulf %305, %309 : vector<2x32xf32>
    %cst_65 = arith.constant dense<0.000000e+00> : vector<2x128xf32>
    %311 = tpu.matmul %272, %79, %cst_65 {dimension_numbers = #tpu.dot_dimension_numbers<[1], [0], [0], [1], [0, 0, 1, 1], [], []>} : vector<2x32xf32>, vector<32x128xf32>, vector<2x128xf32> -> vector<2x128xf32>
    %312 = vector.broadcast %80 : vector<1x128xf32> to vector<2x128xf32>
    %313 = arith.addf %311, %312 : vector<2x128xf32>
    %cst_66 = arith.constant dense<0.000000e+00> : vector<2x128xf32>
    %314 = tpu.matmul %292, %78, %cst_66 {dimension_numbers = #tpu.dot_dimension_numbers<[1], [0], [0], [1], [0, 0, 1, 1], [], []>} : vector<2x32xf32>, vector<32x128xf32>, vector<2x128xf32> -> vector<2x128xf32>
    %315 = arith.addf %313, %314 : vector<2x128xf32>
    %316 = arith.negf %315 : vector<2x128xf32>
    %317 = math.exp %316 : vector<2x128xf32>
    %cst_67 = arith.constant 1.000000e+00 : f32
    %318 = vector.broadcast %cst_67 : f32 to vector<2x128xf32>
    %319 = arith.addf %318, %317 : vector<2x128xf32>
    %320 = arith.divf %318, %319 : vector<2x128xf32>
    %321 = math.tanh %315 : vector<2x128xf32>
    %322 = vector.extract_strided_slice %320 {offsets = [0, 0], sizes = [2, 32], strides = [1, 1]} : vector<2x128xf32> to vector<2x32xf32>
    %323 = vector.extract_strided_slice %320 {offsets = [0, 32], sizes = [2, 32], strides = [1, 1]} : vector<2x128xf32> to vector<2x32xf32>
    %324 = vector.extract_strided_slice %321 {offsets = [0, 64], sizes = [2, 32], strides = [1, 1]} : vector<2x128xf32> to vector<2x32xf32>
    %325 = vector.extract_strided_slice %320 {offsets = [0, 96], sizes = [2, 32], strides = [1, 1]} : vector<2x128xf32> to vector<2x32xf32>
    %326 = arith.mulf %323, %290 : vector<2x32xf32>
    %327 = arith.mulf %322, %324 : vector<2x32xf32>
    %328 = arith.addf %326, %327 : vector<2x32xf32>
    %329 = math.tanh %328 : vector<2x32xf32>
    %330 = arith.mulf %325, %329 : vector<2x32xf32>
    %331 = vector.extract_strided_slice %76 {offsets = [14, 0], sizes = [2, 128], strides = [1, 1]} : vector<16x128xf32> to vector<2x128xf32>
    %cst_68 = arith.constant dense<0.000000e+00> : vector<2x128xf32>
    %332 = tpu.matmul %310, %77, %cst_68 {dimension_numbers = #tpu.dot_dimension_numbers<[1], [0], [0], [1], [0, 0, 1, 1], [], []>} : vector<2x32xf32>, vector<32x128xf32>, vector<2x128xf32> -> vector<2x128xf32>
    %333 = arith.addf %331, %332 : vector<2x128xf32>
    %334 = arith.negf %333 : vector<2x128xf32>
    %335 = math.exp %334 : vector<2x128xf32>
    %cst_69 = arith.constant 1.000000e+00 : f32
    %336 = vector.broadcast %cst_69 : f32 to vector<2x128xf32>
    %337 = arith.addf %336, %335 : vector<2x128xf32>
    %338 = arith.divf %336, %337 : vector<2x128xf32>
    %339 = math.tanh %333 : vector<2x128xf32>
    %340 = vector.extract_strided_slice %338 {offsets = [0, 0], sizes = [2, 32], strides = [1, 1]} : vector<2x128xf32> to vector<2x32xf32>
    %341 = vector.extract_strided_slice %338 {offsets = [0, 32], sizes = [2, 32], strides = [1, 1]} : vector<2x128xf32> to vector<2x32xf32>
    %342 = vector.extract_strided_slice %339 {offsets = [0, 64], sizes = [2, 32], strides = [1, 1]} : vector<2x128xf32> to vector<2x32xf32>
    %343 = vector.extract_strided_slice %338 {offsets = [0, 96], sizes = [2, 32], strides = [1, 1]} : vector<2x128xf32> to vector<2x32xf32>
    %344 = arith.mulf %341, %308 : vector<2x32xf32>
    %345 = arith.mulf %340, %342 : vector<2x32xf32>
    %346 = arith.addf %344, %345 : vector<2x32xf32>
    %347 = math.tanh %346 : vector<2x32xf32>
    %348 = arith.mulf %343, %347 : vector<2x32xf32>
    %cst_70 = arith.constant dense<0.000000e+00> : vector<2x128xf32>
    %349 = tpu.matmul %310, %79, %cst_70 {dimension_numbers = #tpu.dot_dimension_numbers<[1], [0], [0], [1], [0, 0, 1, 1], [], []>} : vector<2x32xf32>, vector<32x128xf32>, vector<2x128xf32> -> vector<2x128xf32>
    %350 = vector.broadcast %80 : vector<1x128xf32> to vector<2x128xf32>
    %351 = arith.addf %349, %350 : vector<2x128xf32>
    %cst_71 = arith.constant dense<0.000000e+00> : vector<2x128xf32>
    %352 = tpu.matmul %330, %78, %cst_71 {dimension_numbers = #tpu.dot_dimension_numbers<[1], [0], [0], [1], [0, 0, 1, 1], [], []>} : vector<2x32xf32>, vector<32x128xf32>, vector<2x128xf32> -> vector<2x128xf32>
    %353 = arith.addf %351, %352 : vector<2x128xf32>
    %354 = arith.negf %353 : vector<2x128xf32>
    %355 = math.exp %354 : vector<2x128xf32>
    %cst_72 = arith.constant 1.000000e+00 : f32
    %356 = vector.broadcast %cst_72 : f32 to vector<2x128xf32>
    %357 = arith.addf %356, %355 : vector<2x128xf32>
    %358 = arith.divf %356, %357 : vector<2x128xf32>
    %359 = math.tanh %353 : vector<2x128xf32>
    %360 = vector.extract_strided_slice %358 {offsets = [0, 0], sizes = [2, 32], strides = [1, 1]} : vector<2x128xf32> to vector<2x32xf32>
    %361 = vector.extract_strided_slice %358 {offsets = [0, 32], sizes = [2, 32], strides = [1, 1]} : vector<2x128xf32> to vector<2x32xf32>
    %362 = vector.extract_strided_slice %359 {offsets = [0, 64], sizes = [2, 32], strides = [1, 1]} : vector<2x128xf32> to vector<2x32xf32>
    %363 = vector.extract_strided_slice %358 {offsets = [0, 96], sizes = [2, 32], strides = [1, 1]} : vector<2x128xf32> to vector<2x32xf32>
    %364 = arith.mulf %361, %328 : vector<2x32xf32>
    %365 = arith.mulf %360, %362 : vector<2x32xf32>
    %366 = arith.addf %364, %365 : vector<2x32xf32>
    %367 = math.tanh %366 : vector<2x32xf32>
    %368 = arith.mulf %363, %367 : vector<2x32xf32>
    %cst_73 = arith.constant dense<0.000000e+00> : vector<2x128xf32>
    %369 = tpu.matmul %348, %79, %cst_73 {dimension_numbers = #tpu.dot_dimension_numbers<[1], [0], [0], [1], [0, 0, 1, 1], [], []>} : vector<2x32xf32>, vector<32x128xf32>, vector<2x128xf32> -> vector<2x128xf32>
    %370 = vector.broadcast %80 : vector<1x128xf32> to vector<2x128xf32>
    %371 = arith.addf %369, %370 : vector<2x128xf32>
    %cst_74 = arith.constant dense<0.000000e+00> : vector<2x128xf32>
    %372 = tpu.matmul %368, %78, %cst_74 {dimension_numbers = #tpu.dot_dimension_numbers<[1], [0], [0], [1], [0, 0, 1, 1], [], []>} : vector<2x32xf32>, vector<32x128xf32>, vector<2x128xf32> -> vector<2x128xf32>
    %373 = arith.addf %371, %372 : vector<2x128xf32>
    %374 = arith.negf %373 : vector<2x128xf32>
    %375 = math.exp %374 : vector<2x128xf32>
    %cst_75 = arith.constant 1.000000e+00 : f32
    %376 = vector.broadcast %cst_75 : f32 to vector<2x128xf32>
    %377 = arith.addf %376, %375 : vector<2x128xf32>
    %378 = arith.divf %376, %377 : vector<2x128xf32>
    %379 = math.tanh %373 : vector<2x128xf32>
    %380 = vector.extract_strided_slice %378 {offsets = [0, 0], sizes = [2, 32], strides = [1, 1]} : vector<2x128xf32> to vector<2x32xf32>
    %381 = vector.extract_strided_slice %378 {offsets = [0, 32], sizes = [2, 32], strides = [1, 1]} : vector<2x128xf32> to vector<2x32xf32>
    %382 = vector.extract_strided_slice %379 {offsets = [0, 64], sizes = [2, 32], strides = [1, 1]} : vector<2x128xf32> to vector<2x32xf32>
    %383 = vector.extract_strided_slice %378 {offsets = [0, 96], sizes = [2, 32], strides = [1, 1]} : vector<2x128xf32> to vector<2x32xf32>
    %384 = arith.mulf %381, %366 : vector<2x32xf32>
    %385 = arith.mulf %380, %382 : vector<2x32xf32>
    %386 = arith.addf %384, %385 : vector<2x32xf32>
    %387 = math.tanh %386 : vector<2x32xf32>
    %388 = arith.mulf %383, %387 : vector<2x32xf32>
    %c120 = arith.constant 120 : index
    %c0_76 = arith.constant 0 : index
    %389 = vector.load %arg2[%c120, %c0_76] : memref<328x128xf32, #tpu.memory_space<vmem>>, vector<32x128xf32>
    %c184 = arith.constant 184 : index
    %c0_77 = arith.constant 0 : index
    %390 = vector.load %arg2[%c184, %c0_77] : memref<328x128xf32, #tpu.memory_space<vmem>>, vector<1x128xf32>
    %cst_78 = arith.constant dense<0.000000e+00> : vector<2x128xf32>
    %391 = tpu.matmul %388, %389, %cst_78 {dimension_numbers = #tpu.dot_dimension_numbers<[1], [0], [0], [1], [0, 0, 1, 1], [], []>} : vector<2x32xf32>, vector<32x128xf32>, vector<2x128xf32> -> vector<2x128xf32>
    %392 = arith.addf %391, %70 : vector<2x128xf32>
    %393 = vector.broadcast %390 : vector<1x128xf32> to vector<2x128xf32>
    %394 = arith.addf %392, %393 : vector<2x128xf32>
    %cst_79 = arith.constant 0.000000e+00 : f32
    %395 = vector.broadcast %cst_79 : f32 to vector<2x128xf32>
    %396 = arith.maximumf %394, %395 : vector<2x128xf32>
    %c192 = arith.constant 192 : index
    %c0_80 = arith.constant 0 : index
    %397 = vector.load %arg2[%c192, %c0_80] : memref<328x128xf32, #tpu.memory_space<vmem>>, vector<128x128xf32>
    %c320 = arith.constant 320 : index
    %c0_81 = arith.constant 0 : index
    %398 = vector.load %arg2[%c320, %c0_81] : memref<328x128xf32, #tpu.memory_space<vmem>>, vector<1x128xf32>
    %cst_82 = arith.constant dense<0.000000e+00> : vector<2x128xf32>
    %399 = tpu.matmul %396, %397, %cst_82 {dimension_numbers = #tpu.dot_dimension_numbers<[1], [0], [0], [1], [0, 0, 1, 1], [], []>} : vector<2x128xf32>, vector<128x128xf32>, vector<2x128xf32> -> vector<2x128xf32>
    %400 = vector.broadcast %398 : vector<1x128xf32> to vector<2x128xf32>
    %401 = arith.addf %399, %400 : vector<2x128xf32>
    %402 = vector.extract_strided_slice %401 {offsets = [0, 0], sizes = [2, 5], strides = [1, 1]} : vector<2x128xf32> to vector<2x5xf32>
    %cst_83 = arith.constant dense<0xFF800000> : vector<2xf32>
    %403 = vector.multi_reduction <maximumf>, %402, %cst_83 [1] : vector<2x5xf32> to vector<2xf32>
    %404 = vector.shape_cast %403 : vector<2xf32> to vector<2x1xf32>
    %405 = vector.broadcast %404 : vector<2x1xf32> to vector<2x5xf32>
    %406 = arith.subf %402, %405 : vector<2x5xf32>
    %407 = math.exp %406 : vector<2x5xf32>
    %cst_84 = arith.constant dense<0.000000e+00> : vector<2xf32>
    %408 = vector.multi_reduction <add>, %407, %cst_84 [1] : vector<2x5xf32> to vector<2xf32>
    %409 = vector.shape_cast %408 : vector<2xf32> to vector<2x1xf32>
    %410 = math.log %409 : vector<2x1xf32>
    %411 = vector.broadcast %410 : vector<2x1xf32> to vector<2x5xf32>
    %412 = arith.subf %406, %411 : vector<2x5xf32>
    %c0_85 = arith.constant 0 : index
    %c0_86 = arith.constant 0 : index
    %413 = vector.load %arg3[%c0_85, %c0_86] : memref<2x5xf32, #tpu.memory_space<vmem>>, vector<2x5xf32>
    tpu.vector_store %arg3[%c0_85, %c0_86], %412 {strides = array<i32>} : memref<2x5xf32, #tpu.memory_space<vmem>>, vector<2x5xf32>,
    return
  }
}

</mosaic_0001>

<bundles_post_ra>
// kernel: rnn_forward.1
= control target key start
LH: loop header
LB: loop body
LE: loop exit
PB: predicated region body
PF: predicated region fallthrough
CT: control target
= control target key end

     0   :  { %8 = vsyncpa [#allocation5], 0  ;;  %s4055_s0 = inlined_call_operand.vmem [shape: f32[16,8], index: 0, kind: input, shape index: {}]   ;;  %s4056_s1 = inlined_call_operand.vmem [shape: s32[6], index: 1, kind: input, shape index: {}]   ;;  %s4057_s2 = inlined_call_operand.hbm [shape: f32[328,128], index: 2, kind: input, shape index: {}]   ;;  %s4058_s3 = inlined_call_operand.hbm [shape: f32[2,5], index: 3, kind: output, shape index: {}]  }
   0x1   :  { %9 = vsyncpa [#allocation3], 0 }
   0x2   :  { %10 = vsyncpa [#allocation4], 0  ;;  %s19_s14 = sshll.u32 %s4056_s1, 4  ;;  %s20_s14 = int_to_ptr.vmem [resolvable:$true] %s19_s14 }
   0x3   :  { %s3556_s15 = scalar_lea.vmem %s20_s14, 16  ;;  %p3561_p1 = scmp.lt.s32.totalorder %s20_s14, %s20_s14 }
   0x4   :  { %p3557_p0 = scmp.ne.s32.totalorder %s20_s14, %s3556_s15  ;;  %p3562_p2 = scmp.lt.s32.totalorder %s3556_s15, %s3556_s15 }
   0x6   :  { %p3563_p3 = por %p3562_p2, %p3561_p1 }
   0x8   :  { %p3564_p4 = pnand %p3563_p3, %p3557_p0 }
   0xa   :  { %3567 = shalt.err (!%p3564_p4)
}
   0xb   :  { %s3618_s16 = smov [#allocation2]   ;;  %s3619_s17 = smov [#allocation6]  }
   0xc   :  { %22 = dma.vmem_to_smem %s20_s14, 16, %s3618_s16, [#allocation5]  }
   0xd   :  { %s28_s18 = sshll.u32 %s3619_s17, 4  ;;  %s3568_s21 = scalar_lea.hbm %s4057_s2, 5248  ;;  %s29_s18 = int_to_ptr.vmem [resolvable:$true] %s28_s18 }
   0xe   :  { %p3569_p5 = scmp.ne.s32.totalorder %s4057_s2, %s3568_s21  ;;  %p3572_p6 = scmp.lt.u32.totalorder %s3568_s21, %s4057_s2 }
  0x10   :  { %p3574_p7 = pnand %p3572_p6, %p3569_p5 }
  0x12   :  { %3577 = shalt.err (!%p3574_p7)
}
  0x13   :  { %s3578_s25 = scalar_lea.vmem %s29_s18, 5248  ;;  %p3583_p9 = scmp.lt.s32.totalorder %s29_s18, %s29_s18 }
  0x14   :  { %p3579_p8 = scmp.ne.s32.totalorder %s29_s18, %s3578_s25  ;;  %p3584_p10 = scmp.lt.s32.totalorder %s3578_s25, %s3578_s25 }
  0x16   :  { %p3585_p11 = por %p3584_p10, %p3583_p9 }
  0x18   :  { %p3586_p12 = pnand %p3585_p11, %p3579_p8 }
  0x1a   :  { %3589 = shalt.err (!%p3586_p12)
}
  0x1b   :  { %s3620_s26 = smov 128   ;;  %s3621_s27 = smov 8  }
  0x1c   :  { %34 = dma.hbm_to_vmem [thread:$0]  %s4057_s2, 5248, %s29_s18, [#allocation3], %s3620_s26, %s3620_s26, %s3621_s27  }
  0x1d   :  { %3612 = dma.done.wait [#allocation5], 16  }
  0x1e   :  { %3613 = vsyncadd [#allocation5], 4294967280 }
  0x1f   :  { %3614 = dma.done.wait [#allocation3], 5248  }
  0x20   :  { %3615 = vsyncadd [#allocation3], 4294962048 }
  0x21   :  { %41 = sfence }
  0x22   :  { %v42_v0 = vld [vmem:[#allocation6 + $0x98] sm:$0xff]  ;;  %v43_v1 = vld [vmem:[#allocation6 + $0xa0] sm:$0xff]  ;;  %v44_v2 = vld [vmem:[#allocation6 + $0xa8] sm:$0xff]  ;;  %v46_v3 = vlaneseq  ;;  %v3622_v4 = vmov 0.0|0.0   ;;  %vm3623_vm0 = vmmov 0   ;;  %v3624_v7 = vmov 0.0  }
  0x23   :  { %3210 = vmatprep.subr.bf16.mxu1 %v3622_v4  ;;  %v3211_v5 = vpack.c.bf16 %v43_v1, %v42_v0  ;;  %v45_v6 = vld [vmem:[#allocation6 + $0xb0] sm:$0xff]  ;;  %2892 = vmatprep.mubr.msk.f32.mxu1 %vm3623_vm0, %v3624_v7  ;;  %s50_s2 = sld [smem:[#allocation2]]  ;;  %s2683_s30 = sld [smem:[#allocation2 + $0x1]]  ;;  %v256_v10 = vld [vmem:[#allocation6 + $0x8] sm:$0xff]  ;;  %v166_v13 = vld [vmem:[#allocation6] sm:$0xff]  ;;  %vm174_vm1 = vcmask 64512  }
  0x24   :  { %v47_v8 = vshrl.u32 %v46_v3, 7  ;;  %s3666_s4 = sld [smem:[#allocation2 + $0x2]]  ;;  %s3668_s5 = sld [smem:[#allocation2 + $0x3]]  ;;  %v3214_v9 = vpack.c.bf16 %v45_v6, %v44_v2  ;;  %v257_v11 = vld [vmem:[#allocation6 + $0x10] sm:$0xff]  ;;  %v49_v12 = vand.u32 127, %v46_v3  ;;  %v168_v14 = vld [vmem:[%s4055_s0] sm:$0xff]  ;;  %2895 = vmatprep.subr.mxu0 %v166_v13 }
  0x25   :  { %3212 = vmatpush3.bf16.msra.mxu1 %v3211_v5  ;;  %s3670_s6 = sld [smem:[#allocation2 + $0x4]]  ;;  %s3672_s7 = sld [smem:[#allocation2 + $0x5]]  ;;  %v169_v15 = vld [vmem:[%s4055_s0 + $0x8] sm:$0xff]  ;;  %2897 = vmatprep.mubr.msk.f32.mxu0 %vm174_vm1, %v168_v14  ;;  %v3681_v17 = vpack.c.bf16 %v257_v11, %v256_v10  ;;  %v258_v20 = vld [vmem:[#allocation6 + $0x18] sm:$0xff]  ;;  %v259_v21 = vld [vmem:[#allocation6 + $0x20] sm:$0xff] }
  0x26   :  { %3213 = vmatprep.subr.bf16.mxu1 %v3622_v4  ;;  %vm51_vm2 = vcmp.eq.s32.totalorder %v47_v8, 0  ;;  %2896 = vmatpush3.msra.mxu0 %v166_v13  ;;  %vm72_vm6 = vcmp.eq.s32.totalorder %v47_v8, 1  ;;  %v3702_v28 = vpack.c.bf16 %v259_v21, %v258_v20  ;;  %v2689_v38 = vld [vmem:[#allocation6 + $0x28] ss:$0 sm:$0xff]  ;;  %s3625_s15 = smov 64   ;;  %s3626_s16 = smov 32  }
  0x27   :  { %2898 = vmatmul.mubr.msk.f32.vlgmr.msra.gmra.mrb[0].mxu0 %vm174_vm1, %v169_v15  ;;  %3240 = vmatprep.subr.bf16.mxu0 %v3622_v4  ;;  %vm92_vm1 = vcmask 261120   ;;  %v264_v61 = vld [vmem:[#allocation6 + $0x30] sm:$0xff]  ;;  %v265_v62 = vld [vmem:[#allocation6 + $0x38] sm:$0xff]  ;;  %v266_v0 = vld [vmem:[#allocation6 + $0x40] sm:$0xff]  ;;  %s3627_s17 = smov [#allocation7]  }
  0x28   :  { %3242 = vmatpush3.bf16.msra.mxu0 %v3681_v17  ;;  %2952 = vmatprep.mubr.msk.f32.mxu0 %vm3623_vm0, %v3624_v7  ;;  %v3743_v63 = vpack.c.bf16 %v265_v62, %v264_v61  ;;  %v267_v1 = vld [vmem:[#allocation6 + $0x48] sm:$0xff]  ;;  %v260_v5 = vld [vmem:[#allocation6 + $0x50] sm:$0xff]  ;;  %v261_v6 = vld [vmem:[#allocation6 + $0x58] sm:$0xff]  ;;  %s2673_s18 = sshll.u32 %s3627_s17, 4  ;;  %s2674_s18 = int_to_ptr.vmem [resolvable:$true] %s2673_s18 }
  0x29   :  { %3215 = vmatpush3.bf16.msra.mxu1 %v3214_v9  ;;  %v52_v16 = vstv %s50_s2  ;;  %s58_s12 = sadd.s32 10, %s2683_s30  ;;  %3243 = vmatprep.subr.bf16.mxu0 %v3622_v4  ;;  %v3747_v3 = vpack.c.bf16 %v267_v1, %v266_v0  ;;  %v3753_v8 = vpack.c.bf16 %v261_v6, %v260_v5  ;;  %v262_v9 = vld [vmem:[#allocation6 + $0x60] sm:$0xff]  ;;  %v263_v10 = vld [vmem:[#allocation6 + $0x68] sm:$0xff]  ;;  %s3590_s19 = scalar_lea.vmem %s2674_s18, 32 }
  0x2a   :  { %3216 = vmatprep.subr.bf16.mxu1 %v3622_v4  ;;  %vm53_vm3 = vcmp.eq.s32.totalorder %v49_v12, %v52_v16  ;;  %v59_v18 = vstv %s58_s12  ;;  %s65_s13 = sadd.s32 20, %s3666_s4  ;;  %v73_v19 = vstv %s3668_s5  ;;  %v3758_v11 = vpack.c.bf16 %v263_v10, %v262_v9  ;;  %v3773_v16 = vld [vmem:[#allocation6 + $0x70] ss:$0 sm:$0xff]  ;;  %p3591_p13 = scmp.ne.s32.totalorder %s2674_s18, %s3590_s19 }
  0x2b   :  { %vm54_vm4 = vmand %vm51_vm2, %vm53_vm3  ;;  %vm60_vm5 = vcmp.eq.s32.totalorder %v49_v12, %v59_v18  ;;  %v66_v22 = vstv %s65_s13  ;;  %vm3688_vm7 = vcmp.eq.s32.totalorder %v49_v12, %v73_v19  ;;  %s79_s0 = sadd.s32 10, %s3670_s6  ;;  %s86_s14 = sadd.s32 20, %s3672_s7 }
  0x2c   :  { %v55_v24 = vsel %vm54_vm4, 1.0, %v3624_v7  ;;  %vm61_vm8 = vmand %vm51_vm2, %vm60_vm5  ;;  %vm67_vm9 = vcmp.eq.s32.totalorder %v49_v12, %v66_v22  ;;  %v80_v25 = vstv %s79_s0  ;;  %v87_v26 = vstv %s86_s14  ;;  %3245 = vmatpush3.bf16.msra.mxu0 %v3702_v28  ;;  %p3595_p0 = scmp.lt.s32.totalorder %s2674_s18, %s2674_s18  ;;  %p3596_p1 = scmp.lt.s32.totalorder %s3590_s19, %s3590_s19 }
  0x2d   :  { %v62_v27 = vsel %vm61_vm8, 1.0, %v3624_v7  ;;  %vm68_vm10 = vmand %vm51_vm2, %vm67_vm9  ;;  %vm81_vm11 = vcmp.eq.s32.totalorder %v49_v12, %v80_v25  ;;  %vm88_vm12 = vcmp.eq.s32.totalorder %v49_v12, %v87_v26  ;;  %3246 = vmatprep.subr.bf16.mxu0 %v3622_v4 }
  0x2e   :  { %v63_v29 = vadd.f32 %v62_v27, %v55_v24  ;;  %v69_v30 = vsel %vm68_vm10, 1.0, %v3624_v7  ;;  %vm75_vm13 = vmand %vm72_vm6, %vm3688_vm7  ;;  %p3597_p2 = por %p3596_p1, %p3595_p0 }
  0x2f   :  { %v76_v31 = vsel %vm75_vm13, 1.0, %v3624_v7  ;;  %vm82_vm14 = vmand %vm72_vm6, %vm81_vm11 }
  0x30   :  { %v70_v32 = vadd.f32 %v69_v30, %v63_v29  ;;  %vm89_vm15 = vmand %vm72_vm6, %vm88_vm12  ;;  %v83_v33 = vsel %vm82_vm14, 1.0, %v3624_v7  ;;  %p3598_p3 = pnand %p3597_p2, %p3591_p13 }
  0x31   :  { %v90_v35 = vsel %vm89_vm15, 1.0, %v3624_v7 }
  0x32   :  { %v77_v34 = vadd.f32 %v76_v31, %v70_v32 }
  0x34   :  { %v84_v36 = vadd.f32 %v83_v33, %v77_v34 }
  0x36   :  { %v91_v37 = vadd.f32 %v90_v35, %v84_v36 }
  0x38   :  { %2893 = vmatmul.mubr.msk.f32.vlgmr.msra.gmra.mrb[0].mxu1 %vm92_vm1, %v91_v37 }
  0x39   :  { %3218 = vmatpush3.bf16.msra.mxu1 %v3681_v17  ;;  %2908 = vmatprep.mubr.msk.f32.mxu1 %vm3623_vm0, %v3624_v7 }
  0x3a   :  { %3219 = vmatprep.subr.bf16.mxu1 %v3622_v4 }
  0x3d   :  { %3221 = vmatpush3.bf16.msra.mxu1 %v3702_v28 }
  0x3e   :  { %3222 = vmatprep.subr.bf16.mxu1 %v3622_v4 }
  0x40   :  { %2909 = vmatmul.mubr.f32.vlgmr.msra.gmra.mrb[2].mxu1 %v3624_v7 }
  0x41   :  { %3224 = vmatpush3.bf16.msra.mxu1 %v3681_v17  ;;  %2919 = vmatprep.mubr.msk.f32.mxu1 %vm3623_vm0, %v3624_v7 }
  0x42   :  { %3225 = vmatprep.subr.bf16.mxu1 %v3622_v4 }
  0x45   :  { %3227 = vmatpush3.bf16.msra.mxu1 %v3702_v28 }
  0x46   :  { %3228 = vmatprep.subr.bf16.mxu1 %v3622_v4 }
  0xfa   :  { %v2899_v39 = vpop.f32.mrb[0].mxu0 }
  0xfb   :  { %v3729_v40 = vadd.f32 %v2899_v39, %v2689_v38  ;;  %v247_v41 = vpop.f32.mrb[1].mxu0 }
  0xfc   :  { %v3733_v44 = vadd.f32 %v2689_v38, %v247_v41 }
 0x10b   :  { %v3731_v42 = vpop.f32.mrb[0].mxu1 }
 0x10c   :  { %v2894_v43 = vpop.f32.mrb[1].mxu1 }
 0x113   :  { %v338_v45 = vpop.f32.mrb[2].mxu1 }
 0x114   :  { %v342_v46 = vadd.f32 %v338_v45, %v3733_v44  ;;  %v2910_v47 = vpop.f32.mrb[3].mxu1 }
 0x116   :  { %3424 = vtanh.f32 %v342_v46  ;;  %v2692_v49 = vmul.f32 -1.442695, %v342_v46 }
 0x118   :  { %3426 = vpow2.f32 %v2692_v49 }
 0x120   :  { %v3425_v48 = vpop.eup %3424 }
 0x121   :  { %352 = vrot.lane.b32.xlu0 %v3425_v48, %s3625_s15 }
 0x122   :  { %v3427_v50 = vpop.eup %3426 }
 0x123   :  { %v346_v51 = vadd.f32 1.0, %v3427_v50 }
 0x125   :  { %3428 = vrcp.f32 %v346_v51 }
 0x12f   :  { %v3429_v52 = vpop.eup %3428 }
 0x130   :  { %v350_v55 = vmul.f32 0.0, %v3429_v52 }
 0x193   :  { %v353_v53 = vpop.permute.xlu0 %352 }
 0x194   :  { %v355_v54 = vmul.f32 %v3429_v52, %v353_v53 }
 0x196   :  { %357 = vrot.lane.b32.xlu0 %v355_v54, %s3626_s16 }
 0x208   :  { %v358_v56 = vpop.permute.xlu0 %357 }
 0x209   :  { %v3738_v57 = vadd.f32 %v358_v56, %v350_v55 }
 0x20b   :  { %3430 = vtanh.f32 %v3738_v57  ;;  %v454_v36 = vrot.slane %v3738_v57, 6 }
 0x215   :  { %v3431_v58 = vpop.eup %3430 }
 0x216   :  { %363 = vrot.lane.b32.xlu1 %v3431_v58, %s3625_s15 }
 0x288   :  { %v364_v59 = vpop.permute.xlu1 %363 }
 0x289   :  { %v366_v60 = vmul.f32 %v3429_v52, %v364_v59 }
 0x28b   :  { %368 = vrot.lane.b32.xlu1 %v366_v60, %s3626_s16 }
 0x2fd   :  { %v369_v2 = vpop.permute.xlu1 %368 }
 0x2fe   :  { %2920 = vmatmul.mubr.msk.f32.vlgmr.msra.gmra.mrb[4].mxu1 %vm92_vm1, %v369_v2 }
 0x2ff   :  { %3230 = vmatpush3.bf16.msra.mxu1 %v3743_v63  ;;  %2930 = vmatprep.mubr.msk.f32.mxu1 %vm3623_vm0, %v3624_v7 }
 0x300   :  { %3231 = vmatprep.subr.bf16.mxu1 %v3622_v4 }
 0x303   :  { %3233 = vmatpush3.bf16.msra.mxu1 %v3747_v3 }
 0x304   :  { %3234 = vmatprep.subr.bf16.mxu1 %v3622_v4 }
 0x306   :  { %2931 = vmatmul.mubr.msk.f32.vlgmr.msra.gmra.mrb[6].mxu1 %vm92_vm1, %v369_v2 }
 0x307   :  { %3236 = vmatpush3.bf16.msra.mxu1 %v3753_v8  ;;  %2941 = vmatprep.mubr.msk.f32.mxu1 %vm3623_vm0, %v3624_v7 }
 0x308   :  { %3237 = vmatprep.subr.bf16.mxu1 %v3622_v4 }
 0x30b   :  { %3239 = vmatpush3.bf16.msra.mxu1 %v3758_v11 }
 0x30c   :  { %3258 = vmatprep.subr.bf16.mxu1 %v3622_v4 }
 0x30e   :  { %2942 = vmatmul.mubr.f32.vlgmr.msra.gmra.mrb[6].mxu1 %v3624_v7 }
 0x30f   :  { %3260 = vmatpush3.bf16.msra.mxu1 %v3681_v17  ;;  %2985 = vmatprep.mubr.msk.f32.mxu1 %vm3623_vm0, %v3624_v7 }
 0x310   :  { %3261 = vmatprep.subr.bf16.mxu1 %v3622_v4 }
 0x313   :  { %3263 = vmatpush3.bf16.msra.mxu1 %v3702_v28 }
 0x314   :  { %3264 = vmatprep.subr.bf16.mxu1 %v3622_v4 }
 0x3d1   :  { %v438_v12 = vpop.f32.mrb[4].mxu1 }
 0x3d2   :  { %v443_v13 = vrot.slane %v438_v12, 6  ;;  %v2921_v14 = vpop.f32.mrb[5].mxu1 }
 0x3d4   :  { %v445_v15 = vadd.f32 %v443_v13, %v3733_v44 }
 0x3d6   :  { %3432 = vtanh.f32 %v445_v15  ;;  %v2694_v23 = vmul.f32 -1.442695, %v445_v15 }
 0x3e0   :  { %v3433_v18 = vpop.eup %3432 }
 0x3e1   :  { %v613_v19 = vpop.f32.mrb[6].mxu1  ;;  %458 = vrot.lane.b32.xlu0 %v3433_v18, %s3625_s15 }
 0x3e2   :  { %v3390_v20 = vadd.f32 %v3773_v16, %v613_v19  ;;  %v2943_v21 = vpop.f32.mrb[7].mxu1 }
 0x3e4   :  { %3434 = vtanh.f32 %v3390_v20  ;;  %v2697_v25 = vmul.f32 -1.442695, %v3390_v20 }
 0x3e5   :  { %3436 = vpow2.f32 %v2694_v23 }
 0x3e6   :  { %3438 = vpow2.f32 %v2697_v25 }
 0x3ee   :  { %v3435_v22 = vpop.eup %3434 }
 0x3ef   :  { %627 = vrot.lane.b32.xlu1 %v3435_v22, %s3625_s15  ;;  %v3437_v24 = vpop.eup %3436 }
 0x3f0   :  { %v449_v26 = vadd.f32 1.0, %v3437_v24  ;;  %v3439_v27 = vpop.eup %3438 }
 0x3f1   :  { %v621_v30 = vadd.f32 1.0, %v3439_v27 }
 0x3f2   :  { %3440 = vrcp.f32 %v449_v26 }
 0x3f3   :  { %3442 = vrcp.f32 %v621_v30 }
 0x3fc   :  { %v3441_v29 = vpop.eup %3440 }
 0x3fd   :  { %v3443_v33 = vpop.eup %3442  ;;  %v456_v37 = vmul.f32 %v3441_v29, %v454_v36 }
 0x3fe   :  { %v625_v43 = vmul.f32 0.0, %v3443_v33 }
 0x453   :  { %v459_v31 = vpop.permute.xlu0 %458 }
 0x454   :  { %v461_v32 = vmul.f32 %v3441_v29, %v459_v31 }
 0x456   :  { %463 = vrot.lane.b32.xlu0 %v461_v32, %s3626_s16 }
 0x461   :  { %v628_v34 = vpop.permute.xlu1 %627 }
 0x462   :  { %v630_v35 = vmul.f32 %v3443_v33, %v628_v34 }
 0x464   :  { %632 = vrot.lane.b32.xlu1 %v630_v35, %s3626_s16 }
 0x4c8   :  { %v464_v38 = vpop.permute.xlu0 %463 }
 0x4c9   :  { %v3781_v39 = vadd.f32 %v464_v38, %v456_v37 }
 0x4cb   :  { %3444 = vtanh.f32 %v3781_v39  ;;  %v730_v20 = vrot.slane %v3781_v39, 6 }
 0x4d5   :  { %v3445_v41 = vpop.eup %3444 }
 0x4d6   :  { %v633_v45 = vpop.permute.xlu1 %632  ;;  %469 = vrot.lane.b32.xlu0 %v3445_v41, %s3625_s15 }
 0x4d7   :  { %v3785_v46 = vadd.f32 %v633_v45, %v625_v43 }
 0x4d9   :  { %3446 = vtanh.f32 %v3785_v46 }
 0x4e3   :  { %v3447_v47 = vpop.eup %3446 }
 0x4e4   :  { %638 = vrot.lane.b32.xlu1 %v3447_v47, %s3625_s15 }
 0x548   :  { %v470_v48 = vpop.permute.xlu0 %469 }
 0x549   :  { %v472_v49 = vmul.f32 %v3441_v29, %v470_v48 }
 0x54b   :  { %v643_v50 = vrot.slane %v472_v49, 2 }
 0x54d   :  { %644 = vrot.lane.b32.xlu0 %v643_v50, %s3626_s16 }
 0x556   :  { %v639_v51 = vpop.permute.xlu1 %638 }
 0x557   :  { %v641_v52 = vmul.f32 %v3443_v33, %v639_v51 }
 0x559   :  { %820 = vrot.lane.b32.xlu1 %v641_v52, %s3626_s16 }
 0x5bf   :  { %v645_v53 = vpop.permute.xlu0 %644 }
 0x5c0   :  { %2953 = vmatmul.mubr.msk.f32.vlgmr.msra.gmra.mrb[2].mxu0 %vm92_vm1, %v645_v53 }
 0x5c1   :  { %3248 = vmatpush3.bf16.msra.mxu0 %v3743_v63  ;;  %2963 = vmatprep.mubr.msk.f32.mxu0 %vm3623_vm0, %v3624_v7 }
 0x5c2   :  { %3249 = vmatprep.subr.bf16.mxu0 %v3622_v4 }
 0x5c5   :  { %3251 = vmatpush3.bf16.msra.mxu0 %v3747_v3 }
 0x5c6   :  { %3252 = vmatprep.subr.bf16.mxu0 %v3622_v4 }
 0x5c8   :  { %2964 = vmatmul.mubr.msk.f32.vlgmr.msra.gmra.mrb[4].mxu0 %vm92_vm1, %v645_v53 }
 0x5c9   :  { %3254 = vmatpush3.bf16.msra.mxu0 %v3753_v8  ;;  %2974 = vmatprep.mubr.msk.f32.mxu0 %vm3623_vm0, %v3624_v7 }
 0x5ca   :  { %3255 = vmatprep.subr.bf16.mxu0 %v3622_v4 }
 0x5cb   :  { %v821_v54 = vpop.permute.xlu1 %820 }
 0x5cd   :  { %3257 = vmatpush3.bf16.msra.mxu0 %v3758_v11 }
 0x5ce   :  { %3276 = vmatprep.subr.bf16.mxu0 %v3622_v4 }
 0x5d0   :  { %2975 = vmatmul.mubr.msk.f32.vlgmr.msra.gmra.mrb[4].mxu0 %vm92_vm1, %v821_v54 }
 0x5d1   :  { %3278 = vmatpush3.bf16.msra.mxu0 %v3681_v17  ;;  %3018 = vmatprep.mubr.msk.f32.mxu0 %vm3623_vm0, %v3624_v7 }
 0x5d2   :  { %3279 = vmatprep.subr.bf16.mxu0 %v3622_v4 }
 0x5d5   :  { %3281 = vmatpush3.bf16.msra.mxu0 %v3702_v28 }
 0x5d6   :  { %3282 = vmatprep.subr.bf16.mxu0 %v3622_v4 }
 0x693   :  { %v714_v55 = vpop.f32.mrb[2].mxu0 }
 0x694   :  { %v719_v56 = vrot.slane %v714_v55, 4  ;;  %v2954_v57 = vpop.f32.mrb[3].mxu0 }
 0x696   :  { %v721_v58 = vadd.f32 %v719_v56, %v3733_v44 }
 0x698   :  { %3448 = vtanh.f32 %v721_v58  ;;  %v2699_v1 = vmul.f32 -1.442695, %v721_v58 }
 0x6a2   :  { %v3449_v59 = vpop.eup %3448 }
 0x6a3   :  { %v890_v60 = vpop.f32.mrb[4].mxu0  ;;  %734 = vrot.lane.b32.xlu0 %v3449_v59, %s3625_s15 }
 0x6a4   :  { %v3391_v61 = vadd.f32 %v3773_v16, %v890_v60  ;;  %v2976_v62 = vpop.f32.mrb[5].mxu0 }
 0x6a6   :  { %3450 = vtanh.f32 %v3391_v61  ;;  %v2702_v5 = vmul.f32 -1.442695, %v3391_v61 }
 0x6a7   :  { %3452 = vpow2.f32 %v2699_v1 }
 0x6a8   :  { %3454 = vpow2.f32 %v2702_v5 }
 0x6b0   :  { %v3451_v0 = vpop.eup %3450 }
 0x6b1   :  { %904 = vrot.lane.b32.xlu1 %v3451_v0, %s3625_s15  ;;  %v3453_v2 = vpop.eup %3452 }
 0x6b2   :  { %v725_v6 = vadd.f32 1.0, %v3453_v2  ;;  %v3455_v9 = vpop.eup %3454 }
 0x6b3   :  { %v898_v12 = vadd.f32 1.0, %v3455_v9 }
 0x6b4   :  { %3456 = vrcp.f32 %v725_v6 }
 0x6b5   :  { %3458 = vrcp.f32 %v898_v12 }
 0x6be   :  { %v3457_v10 = vpop.eup %3456 }
 0x6bf   :  { %v3459_v15 = vpop.eup %3458  ;;  %v732_v21 = vmul.f32 %v3457_v10, %v730_v20 }
 0x6c0   :  { %v902_v25 = vmul.f32 %v3459_v15, %v3785_v46 }
 0x715   :  { %v735_v13 = vpop.permute.xlu0 %734 }
 0x716   :  { %v737_v14 = vmul.f32 %v3457_v10, %v735_v13 }
 0x718   :  { %739 = vrot.lane.b32.xlu0 %v737_v14, %s3626_s16 }
 0x723   :  { %v905_v18 = vpop.permute.xlu1 %904 }
 0x724   :  { %v907_v19 = vmul.f32 %v3459_v15, %v905_v18 }
 0x726   :  { %909 = vrot.lane.b32.xlu1 %v907_v19, %s3626_s16 }
 0x78a   :  { %v740_v22 = vpop.permute.xlu0 %739 }
 0x78b   :  { %v3819_v23 = vadd.f32 %v740_v22, %v732_v21 }
 0x78d   :  { %3460 = vtanh.f32 %v3819_v23  ;;  %v1007_v60 = vrot.slane %v3819_v23, 6 }
 0x797   :  { %v3461_v24 = vpop.eup %3460 }
 0x798   :  { %v910_v26 = vpop.permute.xlu1 %909  ;;  %745 = vrot.lane.b32.xlu0 %v3461_v24, %s3625_s15 }
 0x799   :  { %v3824_v27 = vadd.f32 %v910_v26, %v902_v25 }
 0x79b   :  { %3462 = vtanh.f32 %v3824_v27 }
 0x7a5   :  { %v3463_v29 = vpop.eup %3462 }
 0x7a6   :  { %915 = vrot.lane.b32.xlu1 %v3463_v29, %s3625_s15 }
 0x80a   :  { %v746_v30 = vpop.permute.xlu0 %745 }
 0x80b   :  { %v748_v31 = vmul.f32 %v3457_v10, %v746_v30 }
 0x80d   :  { %v920_v32 = vrot.slane %v748_v31, 4 }
 0x80f   :  { %921 = vrot.lane.b32.xlu0 %v920_v32, %s3626_s16 }
 0x818   :  { %v916_v33 = vpop.permute.xlu1 %915 }
 0x819   :  { %v918_v34 = vmul.f32 %v3459_v15, %v916_v33 }
 0x81b   :  { %1097 = vrot.lane.b32.xlu1 %v918_v34, %s3626_s16 }
 0x881   :  { %v922_v35 = vpop.permute.xlu0 %921 }
 0x882   :  { %2986 = vmatmul.mubr.msk.f32.vlgmr.msra.gmra.mrb[8].mxu1 %vm92_vm1, %v922_v35 }
 0x883   :  { %3266 = vmatpush3.bf16.msra.mxu1 %v3743_v63  ;;  %2996 = vmatprep.mubr.msk.f32.mxu1 %vm3623_vm0, %v3624_v7 }
 0x884   :  { %3267 = vmatprep.subr.bf16.mxu1 %v3622_v4 }
 0x887   :  { %3269 = vmatpush3.bf16.msra.mxu1 %v3747_v3 }
 0x888   :  { %3270 = vmatprep.subr.bf16.mxu1 %v3622_v4 }
 0x88a   :  { %2997 = vmatmul.mubr.msk.f32.vlgmr.msra.gmra.mrb[10].mxu1 %vm92_vm1, %v922_v35 }
 0x88b   :  { %3272 = vmatpush3.bf16.msra.mxu1 %v3753_v8  ;;  %3007 = vmatprep.mubr.msk.f32.mxu1 %vm3623_vm0, %v3624_v7 }
 0x88c   :  { %3273 = vmatprep.subr.bf16.mxu1 %v3622_v4 }
 0x88d   :  { %v1098_v36 = vpop.permute.xlu1 %1097 }
 0x88f   :  { %3275 = vmatpush3.bf16.msra.mxu1 %v3758_v11 }
 0x890   :  { %3294 = vmatprep.subr.bf16.mxu1 %v3622_v4 }
 0x892   :  { %3008 = vmatmul.mubr.msk.f32.vlgmr.msra.gmra.mrb[10].mxu1 %vm92_vm1, %v1098_v36 }
 0x893   :  { %3296 = vmatpush3.bf16.msra.mxu1 %v3681_v17  ;;  %3051 = vmatprep.mubr.msk.f32.mxu1 %vm3623_vm0, %v3624_v7 }
 0x894   :  { %3297 = vmatprep.subr.bf16.mxu1 %v3622_v4 }
 0x897   :  { %3299 = vmatpush3.bf16.msra.mxu1 %v3702_v28 }
 0x898   :  { %3300 = vmatprep.subr.bf16.mxu1 %v3622_v4 }
 0x955   :  { %v991_v37 = vpop.f32.mrb[8].mxu1 }
 0x956   :  { %v996_v38 = vrot.slane %v991_v37, 2  ;;  %v2987_v39 = vpop.f32.mrb[9].mxu1 }
 0x958   :  { %v998_v41 = vadd.f32 %v996_v38, %v3733_v44 }
 0x95a   :  { %3464 = vtanh.f32 %v998_v41  ;;  %v2704_v49 = vmul.f32 -1.442695, %v998_v41 }
 0x964   :  { %v3465_v43 = vpop.eup %3464 }
 0x965   :  { %v1167_v45 = vpop.f32.mrb[10].mxu1  ;;  %1011 = vrot.lane.b32.xlu0 %v3465_v43, %s3625_s15 }
 0x966   :  { %v3392_v46 = vadd.f32 %v3773_v16, %v1167_v45  ;;  %v3009_v47 = vpop.f32.mrb[11].mxu1 }
 0x968   :  { %3466 = vtanh.f32 %v3392_v46  ;;  %v2707_v51 = vmul.f32 -1.442695, %v3392_v46 }
 0x969   :  { %3468 = vpow2.f32 %v2704_v49 }
 0x96a   :  { %3470 = vpow2.f32 %v2707_v51 }
 0x972   :  { %v3467_v48 = vpop.eup %3466 }
 0x973   :  { %1181 = vrot.lane.b32.xlu1 %v3467_v48, %s3625_s15  ;;  %v3469_v50 = vpop.eup %3468 }
 0x974   :  { %v1002_v52 = vadd.f32 1.0, %v3469_v50  ;;  %v3471_v44 = vpop.eup %3470 }
 0x975   :  { %v1175_v54 = vadd.f32 1.0, %v3471_v44 }
 0x976   :  { %3472 = vrcp.f32 %v1002_v52 }
 0x977   :  { %3474 = vrcp.f32 %v1175_v54 }
 0x980   :  { %v3473_v53 = vpop.eup %3472 }
 0x981   :  { %v3475_v57 = vpop.eup %3474  ;;  %v1009_v61 = vmul.f32 %v3473_v53, %v1007_v60 }
 0x982   :  { %v1179_v2 = vmul.f32 %v3475_v57, %v3824_v27 }
 0x9d7   :  { %v1012_v55 = vpop.permute.xlu0 %1011 }
 0x9d8   :  { %v1014_v56 = vmul.f32 %v3473_v53, %v1012_v55 }
 0x9da   :  { %1016 = vrot.lane.b32.xlu0 %v1014_v56, %s3626_s16 }
 0x9e5   :  { %v1182_v58 = vpop.permute.xlu1 %1181 }
 0x9e6   :  { %v1184_v59 = vmul.f32 %v3475_v57, %v1182_v58 }
 0x9e8   :  { %1186 = vrot.lane.b32.xlu1 %v1184_v59, %s3626_s16 }
 0xa4c   :  { %v1017_v62 = vpop.permute.xlu0 %1016 }
 0xa4d   :  { %v3858_v0 = vadd.f32 %v1017_v62, %v1009_v61 }
 0xa4f   :  { %3476 = vtanh.f32 %v3858_v0  ;;  %v1281_v43 = vrot.slane %v3858_v0, 6 }
 0xa59   :  { %v3477_v1 = vpop.eup %3476 }
 0xa5a   :  { %v1187_v5 = vpop.permute.xlu1 %1186  ;;  %1022 = vrot.lane.b32.xlu0 %v3477_v1, %s3625_s15 }
 0xa5b   :  { %v3863_v6 = vadd.f32 %v1187_v5, %v1179_v2 }
 0xa5d   :  { %3478 = vtanh.f32 %v3863_v6 }
 0xa67   :  { %v3479_v9 = vpop.eup %3478 }
 0xa68   :  { %1192 = vrot.lane.b32.xlu1 %v3479_v9, %s3625_s15 }
 0xacc   :  { %v1023_v10 = vpop.permute.xlu0 %1022 }
 0xacd   :  { %v1025_v12 = vmul.f32 %v3473_v53, %v1023_v10 }
 0xacf   :  { %v1197_v13 = vrot.slane %v1025_v12, 6 }
 0xad1   :  { %1198 = vrot.lane.b32.xlu0 %v1197_v13, %s3626_s16 }
 0xada   :  { %v1193_v14 = vpop.permute.xlu1 %1192 }
 0xadb   :  { %v1195_v15 = vmul.f32 %v3475_v57, %v1193_v14 }
 0xadd   :  { %1371 = vrot.lane.b32.xlu1 %v1195_v15, %s3626_s16 }
 0xb43   :  { %v1199_v18 = vpop.permute.xlu0 %1198 }
 0xb44   :  { %3019 = vmatmul.mubr.msk.f32.vlgmr.msra.gmra.mrb[6].mxu0 %vm92_vm1, %v1199_v18 }
 0xb45   :  { %3284 = vmatpush3.bf16.msra.mxu0 %v3743_v63  ;;  %3029 = vmatprep.mubr.msk.f32.mxu0 %vm3623_vm0, %v3624_v7 }
 0xb46   :  { %3285 = vmatprep.subr.bf16.mxu0 %v3622_v4 }
 0xb49   :  { %3287 = vmatpush3.bf16.msra.mxu0 %v3747_v3 }
 0xb4a   :  { %3288 = vmatprep.subr.bf16.mxu0 %v3622_v4 }
 0xb4c   :  { %3030 = vmatmul.mubr.msk.f32.vlgmr.msra.gmra.mrb[8].mxu0 %vm92_vm1, %v1199_v18 }
 0xb4d   :  { %3290 = vmatpush3.bf16.msra.mxu0 %v3753_v8  ;;  %3040 = vmatprep.mubr.msk.f32.mxu0 %vm3623_vm0, %v3624_v7 }
 0xb4e   :  { %3291 = vmatprep.subr.bf16.mxu0 %v3622_v4 }
 0xb4f   :  { %v1372_v19 = vpop.permute.xlu1 %1371 }
 0xb51   :  { %3293 = vmatpush3.bf16.msra.mxu0 %v3758_v11 }
 0xb52   :  { %3312 = vmatprep.subr.bf16.mxu0 %v3622_v4 }
 0xb54   :  { %3041 = vmatmul.mubr.msk.f32.vlgmr.msra.gmra.mrb[8].mxu0 %vm92_vm1, %v1372_v19 }
 0xb55   :  { %3314 = vmatpush3.bf16.msra.mxu0 %v3681_v17  ;;  %3084 = vmatprep.mubr.msk.f32.mxu0 %vm3623_vm0, %v3624_v7 }
 0xb56   :  { %3315 = vmatprep.subr.bf16.mxu0 %v3622_v4 }
 0xb59   :  { %3317 = vmatpush3.bf16.msra.mxu0 %v3702_v28 }
 0xb5a   :  { %3318 = vmatprep.subr.bf16.mxu0 %v3622_v4 }
 0xc17   :  { %v1268_v20 = vpop.f32.mrb[6].mxu0 }
 0xc18   :  { %v1272_v21 = vadd.f32 %v1268_v20, %v3729_v40  ;;  %v3020_v22 = vpop.f32.mrb[7].mxu0 }
 0xc1a   :  { %3480 = vtanh.f32 %v1272_v21  ;;  %v2709_v29 = vmul.f32 -1.442695, %v1272_v21 }
 0xc24   :  { %v3481_v23 = vpop.eup %3480 }
 0xc25   :  { %1285 = vrot.lane.b32.xlu0 %v3481_v23, %s3625_s15 }
 0xc27   :  { %v1441_v24 = vpop.f32.mrb[8].mxu0 }
 0xc28   :  { %v3393_v25 = vadd.f32 %v3773_v16, %v1441_v24  ;;  %v3042_v26 = vpop.f32.mrb[9].mxu0 }
 0xc2a   :  { %3482 = vtanh.f32 %v3393_v25  ;;  %v2712_v31 = vmul.f32 -1.442695, %v3393_v25 }
 0xc2b   :  { %3484 = vpow2.f32 %v2709_v29 }
 0xc2c   :  { %3486 = vpow2.f32 %v2712_v31 }
 0xc34   :  { %v3483_v27 = vpop.eup %3482 }
 0xc35   :  { %1455 = vrot.lane.b32.xlu1 %v3483_v27, %s3625_s15  ;;  %v3485_v30 = vpop.eup %3484 }
 0xc36   :  { %v1276_v32 = vadd.f32 1.0, %v3485_v30  ;;  %v3487_v33 = vpop.eup %3486 }
 0xc37   :  { %v1449_v37 = vadd.f32 1.0, %v3487_v33 }
 0xc38   :  { %3488 = vrcp.f32 %v1276_v32 }
 0xc39   :  { %3490 = vrcp.f32 %v1449_v37 }
 0xc42   :  { %v3489_v34 = vpop.eup %3488 }
 0xc43   :  { %v3491_v38 = vpop.eup %3490  ;;  %v1283_v45 = vmul.f32 %v3489_v34, %v1281_v43 }
 0xc44   :  { %v1453_v49 = vmul.f32 %v3491_v38, %v3863_v6 }
 0xc97   :  { %v1286_v35 = vpop.permute.xlu0 %1285 }
 0xc98   :  { %v1288_v36 = vmul.f32 %v3489_v34, %v1286_v35 }
 0xc9a   :  { %1290 = vrot.lane.b32.xlu0 %v1288_v36, %s3626_s16 }
 0xca7   :  { %v1456_v39 = vpop.permute.xlu1 %1455 }
 0xca8   :  { %v1458_v41 = vmul.f32 %v3491_v38, %v1456_v39 }
 0xcaa   :  { %1460 = vrot.lane.b32.xlu1 %v1458_v41, %s3626_s16 }
 0xd0c   :  { %v1291_v46 = vpop.permute.xlu0 %1290 }
 0xd0d   :  { %v3897_v47 = vadd.f32 %v1291_v46, %v1283_v45 }
 0xd0f   :  { %3492 = vtanh.f32 %v3897_v47  ;;  %v1557_v21 = vrot.slane %v3897_v47, 6 }
 0xd19   :  { %v3493_v48 = vpop.eup %3492 }
 0xd1a   :  { %1296 = vrot.lane.b32.xlu0 %v3493_v48, %s3625_s15 }
 0xd1c   :  { %v1461_v50 = vpop.permute.xlu1 %1460 }
 0xd1d   :  { %v3902_v51 = vadd.f32 %v1461_v50, %v1453_v49 }
 0xd1f   :  { %3494 = vtanh.f32 %v3902_v51 }
 0xd29   :  { %v3495_v52 = vpop.eup %3494 }
 0xd2a   :  { %1466 = vrot.lane.b32.xlu1 %v3495_v52, %s3625_s15 }
 0xd8c   :  { %v1297_v44 = vpop.permute.xlu0 %1296 }
 0xd8d   :  { %v1299_v53 = vmul.f32 %v3489_v34, %v1297_v44 }
 0xd8f   :  { %1471 = vrot.lane.b32.xlu0 %v1299_v53, %s3626_s16 }
 0xd9c   :  { %v1467_v54 = vpop.permute.xlu1 %1466 }
 0xd9d   :  { %v1469_v55 = vmul.f32 %v3491_v38, %v1467_v54 }
 0xd9f   :  { %1647 = vrot.lane.b32.xlu1 %v1469_v55, %s3626_s16 }
 0xe01   :  { %v1472_v56 = vpop.permute.xlu0 %1471 }
 0xe02   :  { %3052 = vmatmul.mubr.msk.f32.vlgmr.msra.gmra.mrb[12].mxu1 %vm92_vm1, %v1472_v56 }
 0xe03   :  { %3302 = vmatpush3.bf16.msra.mxu1 %v3743_v63  ;;  %3062 = vmatprep.mubr.msk.f32.mxu1 %vm3623_vm0, %v3624_v7 }
 0xe04   :  { %3303 = vmatprep.subr.bf16.mxu1 %v3622_v4 }
 0xe07   :  { %3305 = vmatpush3.bf16.msra.mxu1 %v3747_v3 }
 0xe08   :  { %3306 = vmatprep.subr.bf16.mxu1 %v3622_v4 }
 0xe0a   :  { %3063 = vmatmul.mubr.msk.f32.vlgmr.msra.gmra.mrb[14].mxu1 %vm92_vm1, %v1472_v56 }
 0xe0b   :  { %3308 = vmatpush3.bf16.msra.mxu1 %v3753_v8  ;;  %3073 = vmatprep.mubr.msk.f32.mxu1 %vm3623_vm0, %v3624_v7 }
 0xe0c   :  { %3309 = vmatprep.subr.bf16.mxu1 %v3622_v4 }
 0xe0f   :  { %3311 = vmatpush3.bf16.msra.mxu1 %v3758_v11 }
 0xe10   :  { %3330 = vmatprep.subr.bf16.mxu1 %v3622_v4 }
 0xe11   :  { %v1648_v57 = vpop.permute.xlu1 %1647 }
 0xe12   :  { %3074 = vmatmul.mubr.msk.f32.vlgmr.msra.gmra.mrb[14].mxu1 %vm92_vm1, %v1648_v57 }
 0xe13   :  { %3332 = vmatpush3.bf16.msra.mxu1 %v3681_v17  ;;  %3117 = vmatprep.mubr.msk.f32.mxu1 %vm3623_vm0, %v3624_v7 }
 0xe14   :  { %3333 = vmatprep.subr.bf16.mxu1 %v3622_v4 }
 0xe17   :  { %3335 = vmatpush3.bf16.msra.mxu1 %v3702_v28 }
 0xe18   :  { %3336 = vmatprep.subr.bf16.mxu1 %v3622_v4 }
 0xed5   :  { %v1541_v58 = vpop.f32.mrb[12].mxu1 }
 0xed6   :  { %v1546_v59 = vrot.slane %v1541_v58, 6  ;;  %v3053_v60 = vpop.f32.mrb[13].mxu1 }
 0xed8   :  { %v1548_v61 = vadd.f32 %v1546_v59, %v3729_v40 }
 0xeda   :  { %3496 = vtanh.f32 %v1548_v61  ;;  %v2714_v28 = vmul.f32 -1.442695, %v1548_v61 }
 0xee4   :  { %v3497_v62 = vpop.eup %3496 }
 0xee5   :  { %v1717_v0 = vpop.f32.mrb[14].mxu1  ;;  %1561 = vrot.lane.b32.xlu0 %v3497_v62, %s3625_s15 }
 0xee6   :  { %v3394_v17 = vadd.f32 %v3773_v16, %v1717_v0  ;;  %v3075_v1 = vpop.f32.mrb[15].mxu1 }
 0xee8   :  { %3498 = vtanh.f32 %v3394_v17  ;;  %v2717_v6 = vmul.f32 -1.442695, %v3394_v17 }
 0xee9   :  { %3500 = vpow2.f32 %v2714_v28 }
 0xeea   :  { %3502 = vpow2.f32 %v2717_v6 }
 0xef2   :  { %v3499_v2 = vpop.eup %3498 }
 0xef3   :  { %1731 = vrot.lane.b32.xlu1 %v3499_v2, %s3625_s15  ;;  %v3501_v5 = vpop.eup %3500 }
 0xef4   :  { %v1552_v9 = vadd.f32 1.0, %v3501_v5  ;;  %v3503_v10 = vpop.eup %3502 }
 0xef5   :  { %v1725_v13 = vadd.f32 1.0, %v3503_v10 }
 0xef6   :  { %3504 = vrcp.f32 %v1552_v9 }
 0xef7   :  { %3506 = vrcp.f32 %v1725_v13 }
 0xf00   :  { %v3505_v12 = vpop.eup %3504 }
 0xf01   :  { %v3507_v18 = vpop.eup %3506  ;;  %v1559_v22 = vmul.f32 %v3505_v12, %v1557_v21 }
 0xf02   :  { %v1729_v26 = vmul.f32 %v3507_v18, %v3902_v51 }
 0xf57   :  { %v1562_v14 = vpop.permute.xlu0 %1561 }
 0xf58   :  { %v1564_v15 = vmul.f32 %v3505_v12, %v1562_v14 }
 0xf5a   :  { %1566 = vrot.lane.b32.xlu0 %v1564_v15, %s3626_s16 }
 0xf65   :  { %v1732_v19 = vpop.permute.xlu1 %1731 }
 0xf66   :  { %v1734_v20 = vmul.f32 %v3507_v18, %v1732_v19 }
 0xf68   :  { %1736 = vrot.lane.b32.xlu1 %v1734_v20, %s3626_s16 }
 0xfcc   :  { %v1567_v23 = vpop.permute.xlu0 %1566 }
 0xfcd   :  { %v3936_v24 = vadd.f32 %v1567_v23, %v1559_v22 }
 0xfcf   :  { %3508 = vtanh.f32 %v3936_v24  ;;  %v1834_v61 = vrot.slane %v3936_v24, 6 }
 0xfd9   :  { %v3509_v25 = vpop.eup %3508 }
 0xfda   :  { %v1737_v27 = vpop.permute.xlu1 %1736  ;;  %1572 = vrot.lane.b32.xlu0 %v3509_v25, %s3625_s15 }
 0xfdb   :  { %v3941_v29 = vadd.f32 %v1737_v27, %v1729_v26 }
 0xfdd   :  { %3510 = vtanh.f32 %v3941_v29 }
 0xfe7   :  { %v3511_v30 = vpop.eup %3510 }
 0xfe8   :  { %1742 = vrot.lane.b32.xlu1 %v3511_v30, %s3625_s15 }
0x104c   :  { %v1573_v31 = vpop.permute.xlu0 %1572 }
0x104d   :  { %v1575_v32 = vmul.f32 %v3505_v12, %v1573_v31 }
0x104f   :  { %v1747_v33 = vrot.slane %v1575_v32, 2 }
0x1051   :  { %1748 = vrot.lane.b32.xlu0 %v1747_v33, %s3626_s16 }
0x105a   :  { %v1743_v34 = vpop.permute.xlu1 %1742 }
0x105b   :  { %v1745_v35 = vmul.f32 %v3507_v18, %v1743_v34 }
0x105d   :  { %1924 = vrot.lane.b32.xlu1 %v1745_v35, %s3626_s16 }
0x10c3   :  { %v1749_v36 = vpop.permute.xlu0 %1748 }
0x10c4   :  { %3085 = vmatmul.mubr.msk.f32.vlgmr.msra.gmra.mrb[10].mxu0 %vm92_vm1, %v1749_v36 }
0x10c5   :  { %3320 = vmatpush3.bf16.msra.mxu0 %v3743_v63  ;;  %3095 = vmatprep.mubr.msk.f32.mxu0 %vm3623_vm0, %v3624_v7 }
0x10c6   :  { %3321 = vmatprep.subr.bf16.mxu0 %v3622_v4 }
0x10c9   :  { %3323 = vmatpush3.bf16.msra.mxu0 %v3747_v3 }
0x10ca   :  { %3324 = vmatprep.subr.bf16.mxu0 %v3622_v4 }
0x10cc   :  { %3096 = vmatmul.mubr.msk.f32.vlgmr.msra.gmra.mrb[12].mxu0 %vm92_vm1, %v1749_v36 }
0x10cd   :  { %3326 = vmatpush3.bf16.msra.mxu0 %v3753_v8  ;;  %3106 = vmatprep.mubr.msk.f32.mxu0 %vm3623_vm0, %v3624_v7 }
0x10ce   :  { %3327 = vmatprep.subr.bf16.mxu0 %v3622_v4 }
0x10cf   :  { %v1925_v37 = vpop.permute.xlu1 %1924 }
0x10d1   :  { %3329 = vmatpush3.bf16.msra.mxu0 %v3758_v11 }
0x10d2   :  { %3348 = vmatprep.subr.bf16.mxu0 %v3622_v4 }
0x10d4   :  { %3107 = vmatmul.mubr.msk.f32.vlgmr.msra.gmra.mrb[12].mxu0 %vm92_vm1, %v1925_v37 }
0x10d5   :  { %3350 = vmatpush3.bf16.msra.mxu0 %v3743_v63  ;;  %3150 = vmatprep.mubr.msk.f32.mxu0 %vm3623_vm0, %v3624_v7 }
0x10d6   :  { %3351 = vmatprep.subr.bf16.mxu0 %v3622_v4 }
0x10d9   :  { %3353 = vmatpush3.bf16.msra.mxu0 %v3747_v3 }
0x10da   :  { %3354 = vmatprep.subr.bf16.mxu0 %v3622_v4 }
0x1197   :  { %v1818_v38 = vpop.f32.mrb[10].mxu0 }
0x1198   :  { %v1823_v39 = vrot.slane %v1818_v38, 4  ;;  %v3086_v41 = vpop.f32.mrb[11].mxu0 }
0x119a   :  { %v1825_v43 = vadd.f32 %v1823_v39, %v3729_v40 }
0x119c   :  { %3512 = vtanh.f32 %v1825_v43  ;;  %v2719_v50 = vmul.f32 -1.442695, %v1825_v43 }
0x11a6   :  { %v3513_v45 = vpop.eup %3512 }
0x11a7   :  { %v1994_v46 = vpop.f32.mrb[12].mxu0  ;;  %1838 = vrot.lane.b32.xlu0 %v3513_v45, %s3625_s15 }
0x11a8   :  { %v3395_v47 = vadd.f32 %v3773_v16, %v1994_v46  ;;  %v3108_v48 = vpop.f32.mrb[13].mxu0 }
0x11aa   :  { %3514 = vtanh.f32 %v3395_v47  ;;  %v2722_v52 = vmul.f32 -1.442695, %v3395_v47 }
0x11ab   :  { %3516 = vpow2.f32 %v2719_v50 }
0x11ac   :  { %3518 = vpow2.f32 %v2722_v52 }
0x11b4   :  { %v3515_v49 = vpop.eup %3514 }
0x11b5   :  { %2008 = vrot.lane.b32.xlu1 %v3515_v49, %s3625_s15  ;;  %v3517_v51 = vpop.eup %3516 }
0x11b6   :  { %v1829_v44 = vadd.f32 1.0, %v3517_v51  ;;  %v3519_v53 = vpop.eup %3518 }
0x11b7   :  { %v2002_v55 = vadd.f32 1.0, %v3519_v53 }
0x11b8   :  { %3520 = vrcp.f32 %v1829_v44 }
0x11b9   :  { %3522 = vrcp.f32 %v2002_v55 }
0x11c2   :  { %v3521_v54 = vpop.eup %3520 }
0x11c3   :  { %v3523_v58 = vpop.eup %3522  ;;  %v1836_v62 = vmul.f32 %v3521_v54, %v1834_v61 }
0x11c4   :  { %v2006_v2 = vmul.f32 %v3523_v58, %v3941_v29 }
0x1219   :  { %v1839_v56 = vpop.permute.xlu0 %1838 }
0x121a   :  { %v1841_v57 = vmul.f32 %v3521_v54, %v1839_v56 }
0x121c   :  { %1843 = vrot.lane.b32.xlu0 %v1841_v57, %s3626_s16 }
0x1227   :  { %v2009_v59 = vpop.permute.xlu1 %2008 }
0x1228   :  { %v2011_v60 = vmul.f32 %v3523_v58, %v2009_v59 }
0x122a   :  { %2013 = vrot.lane.b32.xlu1 %v2011_v60, %s3626_s16 }
0x128e   :  { %v1844_v0 = vpop.permute.xlu0 %1843 }
0x128f   :  { %v3975_v17 = vadd.f32 %v1844_v0, %v1836_v62 }
0x1291   :  { %3524 = vtanh.f32 %v3975_v17  ;;  %v2111_v38 = vrot.slane %v3975_v17, 6 }
0x129b   :  { %v3525_v1 = vpop.eup %3524 }
0x129c   :  { %v2014_v28 = vpop.permute.xlu1 %2013  ;;  %1849 = vrot.lane.b32.xlu0 %v3525_v1, %s3625_s15 }
0x129d   :  { %v3980_v5 = vadd.f32 %v2014_v28, %v2006_v2  ;;  %v2477_v2 = vld [vmem:[#allocation6 + $0x80] sm:$0xff]  ;;  %v2478_v28 = vld [vmem:[#allocation6 + $0x88] sm:$0xff] }
0x129f   :  { %3526 = vtanh.f32 %v3980_v5 }
0x12a9   :  { %v3527_v6 = vpop.eup %3526 }
0x12aa   :  { %2019 = vrot.lane.b32.xlu1 %v3527_v6, %s3625_s15  ;;  %v2479_v6 = vld [vmem:[#allocation6 + $0x90] sm:$0xff] }
0x130e   :  { %v1850_v9 = vpop.permute.xlu0 %1849 }
0x130f   :  { %v1852_v10 = vmul.f32 %v3521_v54, %v1850_v9  ;;  %v3364_v9 = vpack.c.bf16 %v2479_v6, %v2478_v28 }
0x1311   :  { %v2024_v12 = vrot.slane %v1852_v10, 4 }
0x1313   :  { %2025 = vrot.lane.b32.xlu0 %v2024_v12, %s3626_s16  ;;  %v2562_v12 = vld [vmem:[#allocation6 + $0xc0] sm:$0xff] }
0x131c   :  { %v2020_v13 = vpop.permute.xlu1 %2019 }
0x131d   :  { %v2022_v14 = vmul.f32 %v3523_v58, %v2020_v13  ;;  %v2563_v13 = vld [vmem:[#allocation6 + $0xc8] sm:$0xff] }
0x131f   :  { %2201 = vrot.lane.b32.xlu1 %v2022_v14, %s3626_s16  ;;  %v2564_v14 = vld [vmem:[#allocation6 + $0xd0] sm:$0xff] }
0x1385   :  { %v2026_v15 = vpop.permute.xlu0 %2025 }
0x1386   :  { %3118 = vmatmul.mubr.msk.f32.vlgmr.msra.gmra.mrb[16].mxu1 %vm92_vm1, %v2026_v15 }
0x1387   :  { %3338 = vmatpush3.bf16.msra.mxu1 %v3743_v63  ;;  %3128 = vmatprep.mubr.msk.f32.mxu1 %vm3623_vm0, %v3624_v7 }
0x1388   :  { %3339 = vmatprep.subr.bf16.mxu1 %v3622_v4 }
0x138b   :  { %3341 = vmatpush3.bf16.msra.mxu1 %v3747_v3 }
0x138c   :  { %3342 = vmatprep.subr.bf16.mxu1 %v3622_v4 }
0x138e   :  { %3129 = vmatmul.mubr.msk.f32.vlgmr.msra.gmra.mrb[18].mxu1 %vm92_vm1, %v2026_v15  ;;  %v3367_v15 = vpack.c.bf16 %v2563_v13, %v2562_v12 }
0x138f   :  { %3344 = vmatpush3.bf16.msra.mxu1 %v3753_v8  ;;  %3139 = vmatprep.mubr.msk.f32.mxu1 %vm3623_vm0, %v3624_v7 }
0x1390   :  { %3345 = vmatprep.subr.bf16.mxu1 %v3622_v4 }
0x1391   :  { %v2202_v63 = vpop.permute.xlu1 %2201 }
0x1393   :  { %3347 = vmatpush3.bf16.msra.mxu1 %v3758_v11 }
0x1394   :  { %3360 = vmatprep.subr.bf16.mxu1 %v3622_v4 }
0x1396   :  { %3140 = vmatmul.mubr.msk.f32.vlgmr.msra.gmra.mrb[18].mxu1 %vm92_vm1, %v2202_v63  ;;  %v2565_v63 = vld [vmem:[#allocation6 + $0xd8] sm:$0xff] }
0x1397   :  { %3172 = vmatprep.mubr.msk.f32.mxu1 %vm3623_vm0, %v3624_v7 }
0x1459   :  { %v2095_v3 = vpop.f32.mrb[16].mxu1 }
0x145a   :  { %v2100_v18 = vrot.slane %v2095_v3, 2  ;;  %v3119_v19 = vpop.f32.mrb[17].mxu1  ;;  %v3370_v3 = vpack.c.bf16 %v2565_v63, %v2564_v14 }
0x145b   :  { %v2567_v19 = vld [vmem:[#allocation6 + $0xe8] sm:$0xff] }
0x145c   :  { %v2102_v20 = vadd.f32 %v2100_v18, %v3729_v40  ;;  %v2566_v18 = vld [vmem:[#allocation6 + $0xe0] sm:$0xff] }
0x145e   :  { %3528 = vtanh.f32 %v2102_v20  ;;  %v2724_v26 = vmul.f32 -1.442695, %v2102_v20  ;;  %v3373_v20 = vpack.c.bf16 %v2567_v19, %v2566_v18 }
0x1468   :  { %v3529_v21 = vpop.eup %3528 }
0x1469   :  { %v2271_v22 = vpop.f32.mrb[18].mxu1  ;;  %2115 = vrot.lane.b32.xlu0 %v3529_v21, %s3625_s15  ;;  %v2568_v21 = vld [vmem:[#allocation6 + $0xf0] sm:$0xff] }
0x146a   :  { %v3396_v23 = vadd.f32 %v3773_v16, %v2271_v22  ;;  %v3141_v24 = vpop.f32.mrb[19].mxu1  ;;  %v2569_v22 = vld [vmem:[#allocation6 + $0xf8] sm:$0xff] }
0x146c   :  { %3530 = vtanh.f32 %v3396_v23  ;;  %v2727_v29 = vmul.f32 -1.442695, %v3396_v23 }
0x146d   :  { %3532 = vpow2.f32 %v2724_v26  ;;  %v2570_v26 = vld [vmem:[#allocation6 + $0x100] sm:$0xff] }
0x146e   :  { %3534 = vpow2.f32 %v2727_v29 }
0x1476   :  { %v3531_v25 = vpop.eup %3530 }
0x1477   :  { %2285 = vrot.lane.b32.xlu1 %v3531_v25, %s3625_s15  ;;  %v3533_v27 = vpop.eup %3532  ;;  %v3376_v25 = vpack.c.bf16 %v2569_v22, %v2568_v21 }
0x1478   :  { %v2106_v30 = vadd.f32 1.0, %v3533_v27  ;;  %v3535_v40 = vpop.eup %3534  ;;  %v2571_v27 = vld [vmem:[#allocation6 + $0x108] sm:$0xff] }
0x1479   :  { %v2279_v32 = vadd.f32 1.0, %v3535_v40  ;;  %v3379_v29 = vpack.c.bf16 %v2571_v27, %v2570_v26  ;;  %v2573_v40 = vld [vmem:[#allocation6 + $0x118] sm:$0xff] }
0x147a   :  { %3536 = vrcp.f32 %v2106_v30  ;;  %v2572_v30 = vld [vmem:[#allocation6 + $0x110] sm:$0xff] }
0x147b   :  { %3538 = vrcp.f32 %v2279_v32 }
0x1484   :  { %v3537_v31 = vpop.eup %3536 }
0x1485   :  { %v3539_v35 = vpop.eup %3538  ;;  %v2113_v39 = vmul.f32 %v3537_v31, %v2111_v38 }
0x1486   :  { %v2283_v46 = vmul.f32 %v3539_v35, %v3980_v5 }
0x14db   :  { %v2116_v33 = vpop.permute.xlu0 %2115 }
0x14dc   :  { %v2118_v34 = vmul.f32 %v3537_v31, %v2116_v33  ;;  %v2574_v33 = vld [vmem:[#allocation6 + $0x120] sm:$0xff] }
0x14de   :  { %2120 = vrot.lane.b32.xlu0 %v2118_v34, %s3626_s16  ;;  %v2575_v34 = vld [vmem:[#allocation6 + $0x128] sm:$0xff] }
0x14e9   :  { %v2286_v36 = vpop.permute.xlu1 %2285 }
0x14ea   :  { %v2288_v37 = vmul.f32 %v3539_v35, %v2286_v36  ;;  %v2576_v36 = vld [vmem:[#allocation6 + $0x130] sm:$0xff] }
0x14ec   :  { %2290 = vrot.lane.b32.xlu1 %v2288_v37, %s3626_s16  ;;  %v2577_v37 = vld [vmem:[#allocation6 + $0x138] sm:$0xff] }
0x14ed   :  { %v3388_v38 = vpack.c.bf16 %v2577_v37, %v2576_v36 }
0x1550   :  { %v2121_v41 = vpop.permute.xlu0 %2120 }
0x1551   :  { %v2123_v43 = vadd.f32 %v2121_v41, %v2113_v39  ;;  %v2732_v39 = vld [vmem:[#allocation6 + $0xb8] ss:$0 sm:$0xff] }
0x1553   :  { %3540 = vtanh.f32 %v2123_v43 }
0x155d   :  { %v3541_v45 = vpop.eup %3540 }
0x155e   :  { %v2291_v47 = vpop.permute.xlu1 %2290  ;;  %2126 = vrot.lane.b32.xlu0 %v3541_v45, %s3625_s15 }
0x155f   :  { %v2293_v48 = vadd.f32 %v2291_v47, %v2283_v46 }
0x1561   :  { %3542 = vtanh.f32 %v2293_v48 }
0x156b   :  { %v3543_v49 = vpop.eup %3542 }
0x156c   :  { %2296 = vrot.lane.b32.xlu1 %v3543_v49, %s3625_s15 }
0x15d0   :  { %v2127_v50 = vpop.permute.xlu0 %2126 }
0x15d1   :  { %v2129_v51 = vmul.f32 %v3537_v31, %v2127_v50  ;;  %v3382_v31 = vpack.c.bf16 %v2573_v40, %v2572_v30 }
0x15d3   :  { %v2301_v52 = vrot.slane %v2129_v51, 6 }
0x15d5   :  { %2302 = vrot.lane.b32.xlu0 %v2301_v52, %s3626_s16 }
0x15de   :  { %v2297_v44 = vpop.permute.xlu1 %2296 }
0x15df   :  { %v2299_v53 = vmul.f32 %v3539_v35, %v2297_v44  ;;  %v3385_v35 = vpack.c.bf16 %v2575_v34, %v2574_v33 }
0x15e1   :  { %2377 = vrot.lane.b32.xlu1 %v2299_v53, %s3626_s16 }
0x1647   :  { %v2303_v54 = vpop.permute.xlu0 %2302 }
0x1648   :  { %3151 = vmatmul.mubr.msk.f32.vlgmr.msra.gmra.mrb[14].mxu0 %vm92_vm1, %v2303_v54 }
0x1649   :  { %3356 = vmatpush3.bf16.msra.mxu0 %v3753_v8  ;;  %3161 = vmatprep.mubr.msk.f32.mxu0 %vm3623_vm0, %v3624_v7 }
0x164a   :  { %3357 = vmatprep.subr.bf16.mxu0 %v3622_v4 }
0x164d   :  { %3359 = vmatpush3.bf16.msra.mxu0 %v3758_v11 }
0x164e   :  { %3366 = vmatprep.subr.bf16.mxu0 %v3622_v4 }
0x1653   :  { %v2378_v55 = vpop.permute.xlu1 %2377 }
0x1654   :  { %3162 = vmatmul.mubr.msk.f32.vlgmr.msra.gmra.mrb[14].mxu0 %vm92_vm1, %v2378_v55 }
0x1655   :  { %3207 = vmatprep.mubr.msk.f32.mxu0 %vm3623_vm0, %v3624_v7  ;;  %3368 = vmatpush3.bf16.msra.mxu0 %v3367_v15  ;;  %vm2653_vm0 = vcmask 33792  }
0x1656   :  { %3369 = vmatprep.subr.bf16.mxu0 %v3622_v4 }
0x1659   :  { %3371 = vmatpush3.bf16.msra.mxu0 %v3370_v3 }
0x165a   :  { %3372 = vmatprep.subr.bf16.mxu0 %v3622_v4 }
0x165d   :  { %3374 = vmatpush3.bf16.msra.mxu0 %v3373_v20 }
0x165e   :  { %3375 = vmatprep.subr.bf16.mxu0 %v3622_v4 }
0x1661   :  { %3377 = vmatpush3.bf16.msra.mxu0 %v3376_v25 }
0x1662   :  { %3378 = vmatprep.subr.bf16.mxu0 %v3622_v4 }
0x1665   :  { %3380 = vmatpush3.bf16.msra.mxu0 %v3379_v29 }
0x1666   :  { %3381 = vmatprep.subr.bf16.mxu0 %v3622_v4 }
0x1669   :  { %3383 = vmatpush3.bf16.msra.mxu0 %v3382_v31 }
0x166a   :  { %3384 = vmatprep.subr.bf16.mxu0 %v3622_v4 }
0x166d   :  { %3386 = vmatpush3.bf16.msra.mxu0 %v3385_v35 }
0x166e   :  { %3387 = vmatprep.subr.bf16.mxu0 %v3622_v4 }
0x1671   :  { %3389 = vmatpush3.bf16.msra.mxu0 %v3388_v38 }
0x1727   :  { %v2447_v56 = vpop.f32.mrb[14].mxu0 }
0x1728   :  { %v3397_v57 = vadd.f32 %v3773_v16, %v2447_v56  ;;  %v3163_v58 = vpop.f32.mrb[15].mxu0  ;;  %v2476_v16 = vld [vmem:[#allocation6 + $0x78] sm:$0xff] }
0x1729   :  { %v3361_v5 = vpack.c.bf16 %v2477_v2, %v2476_v16 }
0x172a   :  { %3544 = vtanh.f32 %v3397_v57  ;;  %v2730_v59 = vmul.f32 -1.442695, %v3397_v57 }
0x172b   :  { %3362 = vmatpush3.bf16.msra.mxu1 %v3361_v5 }
0x172c   :  { %3546 = vpow2.f32 %v2730_v59  ;;  %3363 = vmatprep.subr.bf16.mxu1 %v3622_v4 }
0x172f   :  { %3365 = vmatpush3.bf16.msra.mxu1 %v3364_v9 }
0x1734   :  { %v3545_v8 = vpop.eup %3544 }
0x1735   :  { %2461 = vrot.lane.b32.xlu0 %v3545_v8, %s3625_s15 }
0x1736   :  { %v3547_v60 = vpop.eup %3546 }
0x1737   :  { %v2455_v11 = vadd.f32 1.0, %v3547_v60 }
0x1739   :  { %3548 = vrcp.f32 %v2455_v11 }
0x1743   :  { %v3549_v61 = vpop.eup %3548 }
0x1744   :  { %v2459_v17 = vmul.f32 %v3549_v61, %v2293_v48  ;;  %v2733_v48 = vld [vmem:[#allocation6 + $0x140] ss:$0 sm:$0xff] }
0x17a7   :  { %v2462_v62 = vpop.permute.xlu0 %2461 }
0x17a8   :  { %v2464_v0 = vmul.f32 %v3549_v61, %v2462_v62 }
0x17aa   :  { %2466 = vrot.lane.b32.xlu1 %v2464_v0, %s3626_s16 }
0x181c   :  { %v2467_v7 = vpop.permute.xlu1 %2466 }
0x181d   :  { %v2469_v1 = vadd.f32 %v2467_v7, %v2459_v17 }
0x181f   :  { %3550 = vtanh.f32 %v2469_v1 }
0x1829   :  { %v3551_v10 = vpop.eup %3550 }
0x182a   :  { %2472 = vrot.lane.b32.xlu0 %v3551_v10, %s3625_s15 }
0x189c   :  { %v2473_v23 = vpop.permute.xlu0 %2472 }
0x189d   :  { %v2475_v24 = vmul.f32 %v3549_v61, %v2473_v23 }
0x189f   :  { %2482 = vrot.lane.b32.xlu1 %v2475_v24, %s3626_s16 }
0x1911   :  { %v2483_v32 = vpop.permute.xlu1 %2482 }
0x1912   :  { %3173 = vmatmul.mubr.msk.f32.vlgmr.msra.gmra.mrb[20].mxu1 %vm92_vm1, %v2483_v32 }
0x19e5   :  { %v2552_v41 = vpop.f32.mrb[20].mxu1 }
0x19e6   :  { %v2553_v43 = vadd.f32 %v2552_v41, %v3731_v42  ;;  %v3174_v45 = vpop.f32.mrb[21].mxu1 }
0x19e8   :  { %v2560_v46 = vadd.f32 %v2732_v39, %v2553_v43 }
0x19ea   :  { %v2561_v47 = vmax.f32 %v2560_v46, 0.0 }
0x19ec   :  { %3208 = vmatmul.mubr.f32.vlgmr.msra.gmra.mrb[16].mxu0 %v2561_v47 }
0x1abf   :  { %v2649_v49 = vpop.f32.mrb[16].mxu0 }
0x1ac0   :  { %v2650_v50 = vadd.f32 %v2733_v48, %v2649_v49  ;;  %v3209_v51 = vpop.f32.mrb[17].mxu0 }
0x1ac2   :  { %v2654_v52 = vsel %vm2653_vm0, %v2650_v50, -inf }
0x1ac3   :  { %2655 = vmax.xlane.f32.xlu0 %v2654_v52 }
0x1b50   :  { %v2656_v4 = vpop.xlane.xlu0 %2655 }
0x1b51   :  { %v2657_v44 = vsub.f32 %v2650_v50, %v2656_v4 }
0x1b53   :  { %v2658_v53 = vmul.f32 1.442695, %v2657_v44 }
0x1b55   :  { %3552 = vpow2.f32 %v2658_v53 }
0x1b5f   :  { %v3553_v54 = vpop.eup %3552 }
0x1b60   :  { %v2660_v55 = vsel %vm2653_vm0, %v3553_v54, 0.0 }
0x1b61   :  { %2661 = vadd.xlane.f32.xlu1 %v2660_v55 }
0x1bee   :  { %v2662_v42 = vpop.xlane.xlu1 %2661 }
0x1bef   :  { %3554 = vlog2.f32 %v2662_v42 }
0x1bf9   :  { %v3555_v56 = vpop.eup %3554 }
0x1bfa   :  { %v2664_v57 = vmul.f32 0.6931472, %v3555_v56 }
0x1bfc   :  { %v2665_v58 = vsub.f32 %v2657_v44, %v2664_v57 }
0x1bfe   :  { %2666 = vst.msk [vmem:[#allocation7] sm:$0x3] %vm2653_vm0, %v2665_v58 }
0x1bff   :  { %3601 = shalt.err (!%p3598_p3)
}
0x1c00   :  { %s3602_s22 = scalar_lea.hbm %s4058_s3, 32 }
0x1c01   :  { %p3603_p4 = scmp.ne.s32.totalorder %s4058_s3, %s3602_s22  ;;  %p3606_p5 = scmp.lt.u32.totalorder %s3602_s22, %s4058_s3 }
0x1c03   :  { %p3608_p6 = pnand %p3606_p5, %p3603_p4 }
0x1c05   :  { %3611 = shalt.err (!%p3608_p6)
}
0x1c06   :  { %2676 = dma.vmem_to_hbm [thread:$0]  %s2674_s18, 32, %s4058_s3, [#allocation4]  }
0x1c07   :  { %3616 = dma.done.wait [#allocation4], 32  }
0x1c08   :  { %3617 = vsyncadd [#allocation4], 4294967264 }
0x1c09   :  { %2680 = vsyncpa [#allocation3], 1 }
0x1c0a   :  { %2681 = vsyncpa [#allocation4], 1 }
0x1c0b   :  { %2682 = vsyncpa [#allocation5], 1 }

</bundles_post_ra>
